<compile_context>
chip_gen: v7x
topology: tpu7x:2x2x1
jax: 0.10.0
libtpu: 0.0.40
codegen_flags: <defaults>
</compile_context>

<pallas_src>
import jax
import jax.numpy as jnp
from jax.experimental import pallas as pl
from jax.experimental.pallas import tpu as pltpu

LANE = 128


def pinn_mlp_kernel(xT_ref, w1T_ref, b1_ref, w2T_ref, b2_ref, w3T_ref, b3_ref,
                    oT_ref):
    # Batch-on-lanes layout:
    #   xT_ref : (in_dim, bt)    w1T_ref : (hidden, in_dim)   b1 : (hidden, 1)
    #   h1, h2 : (hidden, bt)    w2T_ref : (hidden, hidden)   b2 : (hidden, 1)
    #   oT_ref : (out_dim, bt)   w3T_ref : (out_dim, hidden)  b3 : (out_dim, 1)
    xT = xT_ref[...]
    w1T = w1T_ref[...]
    in_dim = xT.shape[0]

    # Layer 1: K = in_dim (=2) contraction done on the VPU with broadcasts —
    # exact f32, and keeps the tiny contraction off the MXU entirely.
    acc = b1_ref[...]                                   # (hidden, 1)
    for k in range(in_dim):                             # static unroll
        acc = acc + w1T[:, k:k + 1] * xT[k:k + 1, :]    # (hidden, bt)
    h1 = jnp.tanh(acc)

    # Layer 2: the real MXU work (hidden x hidden).
    h2 = jnp.tanh(
        jnp.dot(w2T_ref[...], h1, preferred_element_type=jnp.float32)
        + b2_ref[...]
    )

    # Layer 3: (out_dim, hidden) @ (hidden, bt) -> lane-dense output row.
    oT_ref[...] = (
        jnp.dot(w3T_ref[...], h2, preferred_element_type=jnp.float32)
        + b3_ref[...]
    )


def _num_tensorcores():
    # v7x exposes 2 TensorCores per chip; v5e / v6e have 1.
    try:
        kind = jax.devices()[0].device_kind.lower()
    except Exception:
        return 1
    return 2 if ("v7" in kind or "7x" in kind) else 1


def _choose_tiling(n, in_dim, hidden, out_dim, num_tc):
    """Pick the largest lane-aligned batch tile that fits a conservative VMEM
    budget, using as few grid steps as possible (>= num_tc for megacore)."""
    # Per-lane-column VMEM bytes: double-buffered x/out blocks + f32 h1/h2 temps.
    bytes_per_col = 4 * (2 * (in_dim + out_dim) + 2 * hidden)
    vmem_budget = 8 << 20  # conservative vs v5e's 16 MiB scoped default / v7x VMEM
    max_tile = max(LANE, (vmem_budget // bytes_per_col) // LANE * LANE)
    num_tiles = max(num_tc, pl.cdiv(n, max_tile))
    batch_tile = pl.cdiv(n, num_tiles * LANE) * LANE      # lane-aligned
    num_tiles = pl.cdiv(n, batch_tile)
    return batch_tile, num_tiles


def pinn_forward(xT, w1, b1, w2, b2, w3, b3, *, batch_tile=None):
    """xT: (in_dim, n) f32, batch on the lane axis (generated upstream in this
    layout — no wrapper transpose).  w_i: (in, out); b_i: (1, out).
    Returns u of shape (n, out_dim)."""
    in_dim, n = xT.shape
    hidden = w1.shape[1]
    out_dim = w3.shape[1]

    if batch_tile is None:
        batch_tile, num_tiles = _choose_tiling(n, in_dim, hidden, out_dim,
                                               _num_tensorcores())
    else:
        num_tiles = pl.cdiv(n, batch_tile)
    n_pad = num_tiles * batch_tile

    if n_pad != n:
        # Ragged batch only: pad once; padded columns are sliced off afterwards.
        xT = jnp.pad(xT, ((0, 0), (0, n_pad - n)))

    # Tiny weight-layout prep (outputs on sublanes); negligible vs the call.
    w1T = w1.T                                  # (hidden, in_dim)
    w2T = w2.T                                  # (hidden, hidden)
    w3T = w3.T                                  # (out_dim, hidden)
    b1c = jnp.reshape(b1, (hidden, 1))
    b2c = jnp.reshape(b2, (hidden, 1))
    b3c = jnp.reshape(b3, (out_dim, 1))

    # Advisory cost estimate for XLA scheduling around the PINN loss graph.
    flops = 2 * n_pad * (in_dim * hidden + hidden * hidden + hidden * out_dim)
    bytes_accessed = 4 * (
        n_pad * (in_dim + out_dim)
        + in_dim * hidden + hidden * hidden + hidden * out_dim
        + 2 * hidden + out_dim
    )
    cost = pl.CostEstimate(
        flops=flops,
        transcendentals=2 * n_pad * hidden,
        bytes_accessed=bytes_accessed,
    )

    outT = pl.pallas_call(
        pinn_mlp_kernel,
        out_shape=jax.ShapeDtypeStruct((out_dim, n_pad), jnp.float32),
        grid=(num_tiles,),
        in_specs=[
            # x^T: full (tiny) feature axis on sublanes, batch tile on lanes.
            pl.BlockSpec((in_dim, batch_tile), lambda i: (0, i)),
            # Weights / biases: full blocks, resident across the grid.
            pl.BlockSpec((hidden, in_dim), lambda i: (0, 0)),
            pl.BlockSpec((hidden, 1), lambda i: (0, 0)),
            pl.BlockSpec((hidden, hidden), lambda i: (0, 0)),
            pl.BlockSpec((hidden, 1), lambda i: (0, 0)),
            pl.BlockSpec((out_dim, hidden), lambda i: (0, 0)),
            pl.BlockSpec((out_dim, 1), lambda i: (0, 0)),
        ],
        # Lane-dense output: (out_dim, batch_tile) row per step (unmasked vst).
        out_specs=pl.BlockSpec((out_dim, batch_tile), lambda i: (0, i)),
        compiler_params=pltpu.CompilerParams(
            dimension_semantics=("parallel",),
        ),
        cost_estimate=cost,
    )(xT, w1T, b1c, w2T, b2c, w3T, b3c)

    # Back to the module's (n, out_dim) convention; drop padded columns.
    return outT.T[:n]


def pinn_forward_ref(x, w1, b1, w2, b2, w3, b3):
    h1 = jnp.tanh(x @ w1 + b1)
    h2 = jnp.tanh(h1 @ w2 + b2)
    return h2 @ w3 + b3


if __name__ == "__main__":
    key = jax.random.PRNGKey(0)
    k_x, k_w1, k_w2, k_w3 = jax.random.split(key, 4)

    # Canonical PINN sizes: (x, t) -> u, tanh MLP with a modest collocation set.
    in_dim, hidden, out_dim = 2, 32, 1
    batch = 4096

    # Collocation points generated directly in the kernel's (in_dim, n) layout
    # (free upstream for a PINN data pipeline) — no wrapper transpose/pad.
    xT = jax.random.normal(k_x, (in_dim, batch), dtype=jnp.float32)
    w1 = jax.random.normal(k_w1, (in_dim, hidden), dtype=jnp.float32) * (
        1.0 / jnp.sqrt(in_dim)
    )
    b1 = jnp.zeros((1, hidden), dtype=jnp.float32)
    w2 = jax.random.normal(k_w2, (hidden, hidden), dtype=jnp.float32) * (
        1.0 / jnp.sqrt(hidden)
    )
    b2 = jnp.zeros((1, hidden), dtype=jnp.float32)
    w3 = jax.random.normal(k_w3, (hidden, out_dim), dtype=jnp.float32) * (
        1.0 / jnp.sqrt(hidden)
    )
    b3 = jnp.zeros((1, out_dim), dtype=jnp.float32)

    ref = pinn_forward_ref(xT.T, w1, b1, w2, b2, w3, b3)

    # 1) Aligned batch: 1 grid step on v5e/v6e, 2 "parallel" steps on v7x.
    out = jax.block_until_ready(pinn_forward(xT, w1, b1, w2, b2, w3, b3))
    assert out.shape == (batch, out_dim)
    assert jnp.allclose(out, ref, atol=1e-5, rtol=1e-5)

    # 2) Ragged batch (exercises lane-alignment padding path).
    n_ragged = 1000
    out_r = jax.block_until_ready(
        pinn_forward(xT[:, :n_ragged], w1, b1, w2, b2, w3, b3)
    )
    assert out_r.shape == (n_ragged, out_dim)
    assert jnp.allclose(out_r, ref[:n_ragged], atol=1e-5, rtol=1e-5)

    print("KERNEL_OK")
</pallas_src>

<mosaic_0001>
module attributes {stable_mosaic.version = 11 : i64} {
  func.func @pinn_mlp_kernel(%arg0: i32, %arg1: memref<2x4096xf32, #tpu.memory_space<vmem>>, %arg2: memref<32x2xf32, #tpu.memory_space<vmem>>, %arg3: memref<32x1xf32, #tpu.memory_space<vmem>>, %arg4: memref<32x32xf32, #tpu.memory_space<vmem>>, %arg5: memref<32x1xf32, #tpu.memory_space<vmem>>, %arg6: memref<1x32xf32, #tpu.memory_space<vmem>>, %arg7: memref<1x1xf32, #tpu.memory_space<vmem>>, %arg8: memref<1x4096xf32, #tpu.memory_space<vmem>>) attributes {dimension_semantics = [#tpu.dimension_semantics<parallel>], iteration_bounds = array<i64: 1>, scalar_prefetch = 0 : i64, scratch_operands = 0 : i64, tpu.core_type = #tpu.core_type<tc>, window_params = [{transform_indices = @transform_0, window_bounds = array<i64: 2, 4096>}, {pipeline_mode = #tpu.pipeline_mode<synchronous>, transform_indices = @transform_1, window_bounds = array<i64: 32, 2>}, {pipeline_mode = #tpu.pipeline_mode<synchronous>, transform_indices = @transform_2, window_bounds = array<i64: 32, 1>}, {pipeline_mode = #tpu.pipeline_mode<synchronous>, transform_indices = @transform_3, window_bounds = array<i64: 32, 32>}, {pipeline_mode = #tpu.pipeline_mode<synchronous>, transform_indices = @transform_4, window_bounds = array<i64: 32, 1>}, {pipeline_mode = #tpu.pipeline_mode<synchronous>, transform_indices = @transform_5, window_bounds = array<i64: 1, 32>}, {pipeline_mode = #tpu.pipeline_mode<synchronous>, transform_indices = @transform_6, window_bounds = array<i64: 1, 1>}, {transform_indices = @transform_7, window_bounds = array<i64: 1, 4096>}]} {
    %c0 = arith.constant 0 : index
    %c0_0 = arith.constant 0 : index
    %0 = vector.load %arg1[%c0, %c0_0] : memref<2x4096xf32, #tpu.memory_space<vmem>>, vector<2x4096xf32>
    %c0_1 = arith.constant 0 : index
    %c0_2 = arith.constant 0 : index
    %1 = vector.load %arg2[%c0_1, %c0_2] : memref<32x2xf32, #tpu.memory_space<vmem>>, vector<32x2xf32>
    %c0_3 = arith.constant 0 : index
    %c0_4 = arith.constant 0 : index
    %2 = vector.load %arg3[%c0_3, %c0_4] : memref<32x1xf32, #tpu.memory_space<vmem>>, vector<32x1xf32>
    %3 = vector.extract_strided_slice %1 {offsets = [0, 0], sizes = [32, 1], strides = [1, 1]} : vector<32x2xf32> to vector<32x1xf32>
    %4 = vector.extract_strided_slice %0 {offsets = [0, 0], sizes = [1, 4096], strides = [1, 1]} : vector<2x4096xf32> to vector<1x4096xf32>
    %5 = vector.broadcast %3 : vector<32x1xf32> to vector<32x4096xf32>
    %6 = vector.broadcast %4 : vector<1x4096xf32> to vector<32x4096xf32>
    %7 = arith.mulf %5, %6 : vector<32x4096xf32>
    %8 = vector.broadcast %2 : vector<32x1xf32> to vector<32x4096xf32>
    %9 = arith.addf %8, %7 : vector<32x4096xf32>
    %10 = vector.extract_strided_slice %1 {offsets = [0, 1], sizes = [32, 1], strides = [1, 1]} : vector<32x2xf32> to vector<32x1xf32>
    %11 = vector.extract_strided_slice %0 {offsets = [1, 0], sizes = [1, 4096], strides = [1, 1]} : vector<2x4096xf32> to vector<1x4096xf32>
    %12 = vector.broadcast %10 : vector<32x1xf32> to vector<32x4096xf32>
    %13 = vector.broadcast %11 : vector<1x4096xf32> to vector<32x4096xf32>
    %14 = arith.mulf %12, %13 : vector<32x4096xf32>
    %15 = arith.addf %9, %14 : vector<32x4096xf32>
    %16 = math.tanh %15 : vector<32x4096xf32>
    %c0_5 = arith.constant 0 : index
    %c0_6 = arith.constant 0 : index
    %17 = vector.load %arg4[%c0_5, %c0_6] : memref<32x32xf32, #tpu.memory_space<vmem>>, vector<32x32xf32>
    %cst = arith.constant dense<0.000000e+00> : vector<32x4096xf32>
    %18 = tpu.matmul %17, %16, %cst {dimension_numbers = #tpu.dot_dimension_numbers<[1], [0], [0], [1], [0, 0, 1, 1], [], []>} : vector<32x32xf32>, vector<32x4096xf32>, vector<32x4096xf32> -> vector<32x4096xf32>
    %c0_7 = arith.constant 0 : index
    %c0_8 = arith.constant 0 : index
    %19 = vector.load %arg5[%c0_7, %c0_8] : memref<32x1xf32, #tpu.memory_space<vmem>>, vector<32x1xf32>
    %20 = vector.broadcast %19 : vector<32x1xf32> to vector<32x4096xf32>
    %21 = arith.addf %18, %20 : vector<32x4096xf32>
    %22 = math.tanh %21 : vector<32x4096xf32>
    %c0_9 = arith.constant 0 : index
    %c0_10 = arith.constant 0 : index
    %23 = vector.load %arg6[%c0_9, %c0_10] : memref<1x32xf32, #tpu.memory_space<vmem>>, vector<1x32xf32>
    %cst_11 = arith.constant dense<0.000000e+00> : vector<1x4096xf32>
    %24 = tpu.matmul %23, %22, %cst_11 {dimension_numbers = #tpu.dot_dimension_numbers<[1], [0], [0], [1], [0, 0, 1, 1], [], []>} : vector<1x32xf32>, vector<32x4096xf32>, vector<1x4096xf32> -> vector<1x4096xf32>
    %c0_12 = arith.constant 0 : index
    %c0_13 = arith.constant 0 : index
    %25 = vector.load %arg7[%c0_12, %c0_13] : memref<1x1xf32, #tpu.memory_space<vmem>>, vector<1x1xf32>
    %26 = vector.broadcast %25 : vector<1x1xf32> to vector<1x4096xf32>
    %27 = arith.addf %24, %26 : vector<1x4096xf32>
    %c0_14 = arith.constant 0 : index
    %c0_15 = arith.constant 0 : index
    %28 = vector.load %arg8[%c0_14, %c0_15] : memref<1x4096xf32, #tpu.memory_space<vmem>>, vector<1x4096xf32>
    tpu.vector_store %arg8[%c0_14, %c0_15], %27 {strides = array<i32>} : memref<1x4096xf32, #tpu.memory_space<vmem>>, vector<1x4096xf32>,
    return
  }
  func.func @transform_0(%arg0: i32) -> (i32, i32) {
    %c0_i32 = arith.constant 0 : i32
    %c0_i32_0 = arith.constant 0 : i32
    return %c0_i32, %arg0 : i32, i32
  }
  func.func @transform_1(%arg0: i32) -> (i32, i32) {
    %c0_i32 = arith.constant 0 : i32
    %c0_i32_0 = arith.constant 0 : i32
    %c0_i32_1 = arith.constant 0 : i32
    return %c0_i32, %c0_i32_0 : i32, i32
  }
  func.func @transform_2(%arg0: i32) -> (i32, i32) {
    %c0_i32 = arith.constant 0 : i32
    %c0_i32_0 = arith.constant 0 : i32
    %c0_i32_1 = arith.constant 0 : i32
    return %c0_i32, %c0_i32_0 : i32, i32
  }
  func.func @transform_3(%arg0: i32) -> (i32, i32) {
    %c0_i32 = arith.constant 0 : i32
    %c0_i32_0 = arith.constant 0 : i32
    %c0_i32_1 = arith.constant 0 : i32
    return %c0_i32, %c0_i32_0 : i32, i32
  }
  func.func @transform_4(%arg0: i32) -> (i32, i32) {
    %c0_i32 = arith.constant 0 : i32
    %c0_i32_0 = arith.constant 0 : i32
    %c0_i32_1 = arith.constant 0 : i32
    return %c0_i32, %c0_i32_0 : i32, i32
  }
  func.func @transform_5(%arg0: i32) -> (i32, i32) {
    %c0_i32 = arith.constant 0 : i32
    %c0_i32_0 = arith.constant 0 : i32
    %c0_i32_1 = arith.constant 0 : i32
    return %c0_i32, %c0_i32_0 : i32, i32
  }
  func.func @transform_6(%arg0: i32) -> (i32, i32) {
    %c0_i32 = arith.constant 0 : i32
    %c0_i32_0 = arith.constant 0 : i32
    %c0_i32_1 = arith.constant 0 : i32
    return %c0_i32, %c0_i32_0 : i32, i32
  }
  func.func @transform_7(%arg0: i32) -> (i32, i32) {
    %c0_i32 = arith.constant 0 : i32
    %c0_i32_0 = arith.constant 0 : i32
    return %c0_i32, %arg0 : i32, i32
  }
}

</mosaic_0001>

<bundles_post_ra>
// kernel: tpu_custom_call.1
= control target key start
LH: loop header
LB: loop body
LE: loop exit
PB: predicated region body
PF: predicated region fallthrough
CT: control target
= control target key end

     0   :  { %s6807_s0 = inlined_call_operand.vmem [shape: f32[2,4096], index: 0, kind: input, shape index: {}]   ;;  %s6808_s1 = inlined_call_operand.vmem [shape: f32[32,2], index: 1, kind: input, shape index: {}]   ;;  %s6809_s2 = inlined_call_operand.vmem [shape: f32[32,1], index: 2, kind: input, shape index: {}]   ;;  %s6810_s3 = inlined_call_operand.vmem [shape: f32[32,32], index: 3, kind: input, shape index: {}]   ;;  %s6811_s4 = inlined_call_operand.vmem [shape: f32[32,1], index: 4, kind: input, shape index: {}]   ;;  %s6812_s5 = inlined_call_operand.vmem [shape: f32[1,32], index: 5, kind: input, shape index: {}]   ;;  %s6813_s6 = inlined_call_operand.<no memory space> [shape: f32[1,1], index: 6, kind: input, shape index: {}]   ;;  %s6814_s7 = inlined_call_operand.hbm [shape: f32[1,4096], index: 7, kind: output, shape index: {}]  }
   0x1   :  { %v12_v0 = vstv %s6813_s6 }
   0x2   :  { %13 = vst [vmem:[#allocation2] sm:$0x1] %v12_v0 }
   0x3   :  { %v41_v1 = vld [vmem:[%s6809_s2] sm:$0xff]  ;;  %v5209_v3 = vmov 0   ;;  %v42_v4 = vld [vmem:[%s6809_s2 + $0x8] sm:$0xff] }
   0x4   :  { %v37_v2 = vld [vmem:[%s6808_s1] sm:$0xff]  ;;  %4660 = vset.pattern.permute.xlu1 %v5209_v3  ;;  %4659 = vset.pattern.permute.xlu0 %v5209_v3  ;;  %v38_v5 = vld [vmem:[%s6808_s1 + $0x8] sm:$0xff] }
   0x5   :  { %491 = vperm.xlu1 %4660, %v41_v1   ;;  %47 = vperm.xlu0 %4659, %v37_v2  }
   0x6   :  { %14 = vsyncpa [#allocation4], 0  ;;  %v40_v6 = vld [vmem:[%s6808_s1 + $0x18] sm:$0xff]  ;;  %v5210_v7 = vmov 1   ;;  %v39_v8 = vld [vmem:[%s6808_s1 + $0x10] sm:$0xff]  ;;  %v6815_v11 = vmov 0.0   ;;  %v73_v12 = vlaneseq }
   0x7   :  { %v43_v9 = vld [vmem:[%s6809_s2 + $0x10] sm:$0xff]  ;;  %v44_v10 = vld [vmem:[%s6809_s2 + $0x18] sm:$0xff]  ;;  %1430 = vmatprep.mubr.f32.mxu0 %v6815_v11  ;;  %1519 = vmatprep.mubr.f32.mxu1 %v6815_v11  ;;  %v29_v15 = vld [vmem:[%s6807_s0] sm:$0xff]  ;;  %vm1353_vm0 = vcmask 261120  }
   0x8   :  { %v5283_v13 = vshrl.u32 %v73_v12, 7  ;;  %v30_v25 = vld [vmem:[%s6807_s0 + $0x8] sm:$0xff]  ;;  %v31_v32 = vld [vmem:[%s6807_s0 + $0x10] sm:$0xff]  ;;  %v32_v53 = vld [vmem:[%s6807_s0 + $0x18] sm:$0xff] }
   0x9   :  { %496 = vperm.xlu1 %4660, %v42_v4   ;;  %52 = vperm.xlu0 %4659, %v38_v5   ;;  %v33_v62 = vld [vmem:[%s6807_s0 + $0x20] sm:$0xff] }
   0xa   :  { %6863 = vst [vmem:[#allocation6_spill] sm:$0xff] %v5283_v13  ;;  %v5286_v14 = vsub.s32 2, %v5283_v13  ;;  %v5292_v16 = vsub.s32 6, %v5283_v13  ;;  %v5295_v17 = vsub.s32 0, %v5283_v13  ;;  %v5298_v18 = vsub.s32 3, %v5283_v13 }
   0xb   :  { %v5302_v20 = vsub.s32 1, %v5283_v13  ;;  %v5305_v21 = vsub.s32 7, %v5283_v13  ;;  %v5308_v22 = vsub.s32 4, %v5283_v13  ;;  %v5312_v24 = vsub.s32 5, %v5283_v13 }
   0xc   :  { %6864 = vst [vmem:[#allocation7_spill] sm:$0xff] %v5286_v14  ;;  %6865 = vst [vmem:[#allocation8_spill] sm:$0xff] %v5292_v16  ;;  %v80_v19 = vrot.slane %v29_v15, %v5286_v14  ;;  %v88_v23 = vrot.slane %v29_v15, %v5292_v16  ;;  %v660_v26 = vrot.slane %v29_v15, %v5298_v18 }
   0xd   :  { %4661 = vset.pattern.permute.xlu1 %v5210_v7  ;;  %62 = vperm.xlu0 %4659, %v40_v6   ;;  %6866 = vst [vmem:[#allocation9_spill] sm:$0xff] %v5295_v17  ;;  %6867 = vst [vmem:[#allocation10_spill] sm:$0xff] %v5298_v18  ;;  %v76_v27 = vrot.slane %v29_v15, %v5295_v17  ;;  %v668_v29 = vrot.slane %v29_v15, %v5305_v21 }
   0xe   :  { %642 = vperm.xlu1 %4661, %v38_v5   ;;  %6868 = vst [vmem:[#allocation11_spill] sm:$0xff] %v5302_v20  ;;  %6869 = vst [vmem:[#allocation12_spill] sm:$0xff] %v5305_v21  ;;  %v5320_v28 = vrot.slane %v80_v19, %v5295_v17  ;;  %v656_v30 = vrot.slane %v29_v15, %v5302_v20  ;;  %v84_v31 = vrot.slane %v29_v15, %v5308_v22 }
   0xf   :  { %6870 = vst [vmem:[#allocation13_spill] sm:$0xff] %v5308_v22  ;;  %6871 = vst [vmem:[#allocation14_spill] sm:$0xff] %v5312_v24  ;;  %v5329_v33 = vrot.slane %v88_v23, %v5295_v17  ;;  %v664_v34 = vrot.slane %v29_v15, %v5312_v24  ;;  %v96_v35 = vrot.slane %v30_v25, %v5286_v14 }
  0x10   :  { %v676_v36 = vrot.slane %v30_v25, %v5298_v18  ;;  %v104_v37 = vrot.slane %v30_v25, %v5292_v16  ;;  %v684_v38 = vrot.slane %v30_v25, %v5305_v21  ;;  %v92_v39 = vrot.slane %v30_v25, %v5295_v17 }
  0x11   :  { %4663 = vset.pattern.permute.xlu0 %v5210_v7  ;;  %v100_v40 = vrot.slane %v30_v25, %v5308_v22  ;;  %v5339_v41 = vrot.slane %v76_v27, %v5295_v17  ;;  %v672_v42 = vrot.slane %v30_v25, %v5302_v20  ;;  %v680_v43 = vrot.slane %v30_v25, %v5312_v24 }
  0x12   :  { %4662 = vset.pattern.permute.xlu1 %v5209_v3  ;;  %638 = vperm.xlu0 %4663, %v37_v2   ;;  %v112_v44 = vrot.slane %v31_v32, %v5286_v14  ;;  %v5345_v45 = vrot.slane %v660_v26, %v5302_v20  ;;  %v5348_v46 = vrot.slane %v668_v29, %v5302_v20 }
  0x13   :  { %57 = vperm.xlu1 %4662, %v39_v8   ;;  %v5351_v47 = vrot.slane %v656_v30, %v5302_v20  ;;  %v5354_v48 = vrot.slane %v84_v31, %v5295_v17  ;;  %v5357_v49 = vrot.slane %v664_v34, %v5302_v20  ;;  %v5360_v50 = vrot.slane %v96_v35, %v5295_v17  ;;  %v34_v35 = vld [vmem:[%s6807_s0 + $0x28] sm:$0xff] }
  0x14   :  { %v5363_v51 = vrot.slane %v676_v36, %v5302_v20  ;;  %v120_v52 = vrot.slane %v31_v32, %v5292_v16  ;;  %v5370_v54 = vrot.slane %v104_v37, %v5295_v17  ;;  %v5373_v55 = vrot.slane %v684_v38, %v5302_v20 }
  0x15   :  { %v5376_v56 = vrot.slane %v92_v39, %v5295_v17  ;;  %v5379_v57 = vrot.slane %v100_v40, %v5295_v17  ;;  %v5382_v58 = vrot.slane %v672_v42, %v5302_v20  ;;  %v5385_v59 = vrot.slane %v680_v43, %v5302_v20 }
  0x16   :  { %646 = vperm.xlu0 %4663, %v39_v8   ;;  %v5388_v60 = vrot.slane %v112_v44, %v5295_v17  ;;  %v108_v61 = vrot.slane %v31_v32, %v5295_v17  ;;  %v692_v63 = vrot.slane %v31_v32, %v5298_v18  ;;  %v700_v0 = vrot.slane %v31_v32, %v5305_v21 }
  0x17   :  { %501 = vperm.xlu1 %4662, %v43_v9   ;;  %v116_v1 = vrot.slane %v31_v32, %v5308_v22  ;;  %v128_v2 = vrot.slane %v32_v53, %v5286_v14  ;;  %v688_v4 = vrot.slane %v31_v32, %v5302_v20  ;;  %v696_v5 = vrot.slane %v31_v32, %v5312_v24 }
  0x18   :  { %v124_v8 = vrot.slane %v32_v53, %v5295_v17  ;;  %v132_v9 = vrot.slane %v32_v53, %v5308_v22  ;;  %v5409_v12 = vrot.slane %v108_v61, %v5295_v17  ;;  %v716_v15 = vrot.slane %v32_v53, %v5305_v21 }
  0x19   :  { %v704_v19 = vrot.slane %v32_v53, %v5302_v20  ;;  %v712_v23 = vrot.slane %v32_v53, %v5312_v24  ;;  %v5415_v25 = vrot.slane %v692_v63, %v5302_v20  ;;  %v5418_v26 = vrot.slane %v700_v0, %v5302_v20 }
  0x1a   :  { %4666 = vset.pattern.permute.xlu0 %v5209_v3  ;;  %6872 = vst [vmem:[#allocation15_spill] sm:$0xff] %v5409_v12  ;;  %v5421_v27 = vrot.slane %v116_v1, %v5295_v17  ;;  %v5424_v29 = vrot.slane %v128_v2, %v5295_v17  ;;  %v5427_v30 = vrot.slane %v688_v4, %v5302_v20 }
  0x1b   :  { %506 = vperm.xlu1 %4662, %v44_v10   ;;  %v144_v10 = vrot.slane %v33_v62, %v5286_v14  ;;  %6873 = vst [vmem:[#allocation16_spill] sm:$0xff] %v5418_v26  ;;  %v5430_v31 = vrot.slane %v696_v5, %v5302_v20  ;;  %v152_v34 = vrot.slane %v33_v62, %v5292_v16 }
  0x1c   :  { %6874 = vst [vmem:[#allocation17_spill] sm:$0xff] %v5421_v27  ;;  %6875 = vst [vmem:[#allocation18_spill] sm:$0xff] %v5424_v29  ;;  %v5443_v37 = vrot.slane %v124_v8, %v5295_v17  ;;  %v5446_v38 = vrot.slane %v132_v9, %v5295_v17  ;;  %v5452_v40 = vrot.slane %v716_v15, %v5302_v20 }
  0x1d   :  { %6876 = vst [vmem:[#allocation19_spill] sm:$0xff] %v5427_v30  ;;  %6877 = vst [vmem:[#allocation20_spill] sm:$0xff] %v5430_v31  ;;  %v5449_v39 = vrot.slane %v144_v10, %v5295_v17  ;;  %v5455_v42 = vrot.slane %v704_v19, %v5302_v20  ;;  %v5458_v43 = vrot.slane %v712_v23, %v5302_v20 }
  0x1e   :  { %6880 = vst [vmem:[#allocation23_spill] sm:$0xff] %v5443_v37  ;;  %6881 = vst [vmem:[#allocation24_spill] sm:$0xff] %v5446_v38  ;;  %v140_v44 = vrot.slane %v33_v62, %v5295_v17  ;;  %v732_v61 = vrot.slane %v33_v62, %v5305_v21  ;;  %v148_v63 = vrot.slane %v33_v62, %v5308_v22 }
  0x1f   :  { %4664 = vset.pattern.permute.xlu1 %v5210_v7  ;;  %v708_v7 = vrot.slane %v32_v53, %v5298_v18  ;;  %6882 = vst [vmem:[#allocation25_spill] sm:$0xff] %v5449_v39  ;;  %6883 = vst [vmem:[#allocation26_spill] sm:$0xff] %v5452_v40  ;;  %v160_v0 = vrot.slane %v34_v35, %v5286_v14  ;;  %v5469_v1 = vrot.slane %v152_v34, %v5295_v17 }
  0x20   :  { %650 = vperm.xlu1 %4664, %v40_v6   ;;  %v136_v6 = vrot.slane %v32_v53, %v5292_v16  ;;  %6884 = vst [vmem:[#allocation27_spill] sm:$0xff] %v5455_v42  ;;  %6885 = vst [vmem:[#allocation28_spill] sm:$0xff] %v5458_v43  ;;  %v724_v53 = vrot.slane %v33_v62, %v5298_v18  ;;  %v720_v2 = vrot.slane %v33_v62, %v5302_v20 }
  0x21   :  { %v5440_v36 = vrot.slane %v708_v7, %v5302_v20  ;;  %6886 = vst [vmem:[#allocation29_spill] sm:$0xff] %v5469_v1  ;;  %v728_v4 = vrot.slane %v33_v62, %v5312_v24  ;;  %v168_v5 = vrot.slane %v34_v35, %v5292_v16  ;;  %v156_v7 = vrot.slane %v34_v35, %v5295_v17 }
  0x22   :  { %v5433_v32 = vrot.slane %v136_v6, %v5295_v17  ;;  %v740_v6 = vrot.slane %v34_v35, %v5298_v18  ;;  %v164_v8 = vrot.slane %v34_v35, %v5308_v22  ;;  %v5479_v10 = vrot.slane %v140_v44, %v5295_v17 }
  0x23   :  { %6879 = vst [vmem:[#allocation22_spill] sm:$0xff] %v5440_v36  ;;  %v748_v15 = vrot.slane %v34_v35, %v5305_v21  ;;  %v736_v19 = vrot.slane %v34_v35, %v5302_v20  ;;  %v744_v23 = vrot.slane %v34_v35, %v5312_v24  ;;  %v5485_v62 = vrot.slane %v724_v53, %v5302_v20 }
  0x24   :  { %4665 = vset.pattern.permute.xlu1 %v5209_v3  ;;  %v5399_v3 = vrot.slane %v120_v52, %v5295_v17  ;;  %6878 = vst [vmem:[#allocation21_spill] sm:$0xff] %v5433_v32  ;;  %v35_v52 = vld [vmem:[%s6807_s0 + $0x30] sm:$0xff]  ;;  %6887 = vst [vmem:[#allocation30_spill] sm:$0xff] %v5479_v10  ;;  %v5488_v34 = vrot.slane %v732_v61, %v5302_v20  ;;  %v5491_v11 = vrot.slane %v148_v63, %v5295_v17 }
  0x25   :  { %v176_v9 = vrot.slane %v35_v52, %v5286_v14  ;;  %6888 = vst [vmem:[#allocation31_spill] sm:$0xff] %v5485_v62  ;;  %v5494_v13 = vrot.slane %v160_v0, %v5295_v17  ;;  %v5497_v44 = vrot.slane %v720_v2, %v5302_v20  ;;  %v5500_v14 = vrot.slane %v728_v4, %v5302_v20 }
  0x26   :  { %6889 = vst [vmem:[#allocation32_spill] sm:$0xff] %v5488_v34  ;;  %6890 = vst [vmem:[#allocation33_spill] sm:$0xff] %v5491_v11  ;;  %v5503_v35 = vrot.slane %v168_v5, %v5295_v17  ;;  %v184_v53 = vrot.slane %v35_v52, %v5292_v16  ;;  %v5507_v61 = vrot.slane %v740_v6, %v5302_v20 }
  0x27   :  { %6891 = vst [vmem:[#allocation34_spill] sm:$0xff] %v5494_v13  ;;  %6892 = vst [vmem:[#allocation35_spill] sm:$0xff] %v5497_v44  ;;  %v5510_v63 = vrot.slane %v156_v7, %v5295_v17  ;;  %v5513_v0 = vrot.slane %v164_v8, %v5295_v17  ;;  %v5516_v2 = vrot.slane %v176_v9, %v5295_v17 }
  0x28   :  { %6893 = vst [vmem:[#allocation36_spill] sm:$0xff] %v5500_v14  ;;  %6894 = vst [vmem:[#allocation37_spill] sm:$0xff] %v5503_v35  ;;  %v5523_v5 = vrot.slane %v748_v15, %v5302_v20  ;;  %v5526_v52 = vrot.slane %v736_v19, %v5302_v20  ;;  %v5529_v6 = vrot.slane %v744_v23, %v5302_v20 }
  0x29   :  { %6895 = vst [vmem:[#allocation38_spill] sm:$0xff] %v5507_v61  ;;  %6896 = vst [vmem:[#allocation39_spill] sm:$0xff] %v5510_v63  ;;  %v5532_v7 = vrot.slane %v184_v53, %v5295_v17 }
  0x2a   :  { %6897 = vst [vmem:[#allocation40_spill] sm:$0xff] %v5513_v0  ;;  %6898 = vst [vmem:[#allocation41_spill] sm:$0xff] %v5516_v2 }
  0x2b   :  { %6899 = vst [vmem:[#allocation42_spill] sm:$0xff] %v5523_v5  ;;  %6900 = vst [vmem:[#allocation43_spill] sm:$0xff] %v5526_v52 }
  0x2c   :  { %6901 = vst [vmem:[#allocation44_spill] sm:$0xff] %v5529_v6  ;;  %6902 = vst [vmem:[#allocation45_spill] sm:$0xff] %v5532_v7 }
  0x84   :  { %v5518_v24 = vpop.permute.xlu1 %491  ;;  %v5520_v4 = vpop.permute.xlu0 %47 }
  0x85   :  { %v362_v8 = vmul.f32 %v5320_v28, %v5520_v4  ;;  %v364_v9 = vmul.f32 %v5329_v33, %v5520_v4  ;;  %v361_v16 = vmul.f32 %v5339_v41, %v5520_v4  ;;  %v363_v15 = vmul.f32 %v5354_v48, %v5520_v4 }
  0x86   :  { %v366_v19 = vmul.f32 %v5360_v50, %v5520_v4  ;;  %v368_v23 = vmul.f32 %v5370_v54, %v5520_v4  ;;  %v365_v53 = vmul.f32 %v5376_v56, %v5520_v4  ;;  %v367_v22 = vmul.f32 %v5379_v57, %v5520_v4 }
  0x87   :  { %v510_v17 = vadd.f32 %v5518_v24, %v362_v8  ;;  %v512_v21 = vadd.f32 %v5518_v24, %v364_v9  ;;  %v509_v20 = vadd.f32 %v5518_v24, %v361_v16  ;;  %v511_v7 = vadd.f32 %v5518_v24, %v363_v15 }
  0x88   :  { %v5554_v18 = vpop.permute.xlu1 %496  ;;  %v5556_v2 = vpop.permute.xlu0 %52  ;;  %v5559_v6 = vadd.f32 %v5518_v24, %v366_v19  ;;  %v5562_v0 = vadd.f32 %v5518_v24, %v368_v23  ;;  %v5565_v52 = vadd.f32 %v5518_v24, %v365_v53  ;;  %v5568_v8 = vadd.f32 %v5518_v24, %v367_v22 }
  0x89   :  { %v394_v16 = vmul.f32 %v5320_v28, %v5556_v2  ;;  %v396_v9 = vmul.f32 %v5329_v33, %v5556_v2  ;;  %v393_v15 = vmul.f32 %v5339_v41, %v5556_v2  ;;  %v395_v19 = vmul.f32 %v5354_v48, %v5556_v2 }
  0x8a   :  { %v398_v23 = vmul.f32 %v5360_v50, %v5556_v2  ;;  %v400_v53 = vmul.f32 %v5370_v54, %v5556_v2  ;;  %v397_v22 = vmul.f32 %v5376_v56, %v5556_v2  ;;  %v399_v63 = vmul.f32 %v5379_v57, %v5556_v2 }
  0x8b   :  { %v542_v5 = vadd.f32 %v5554_v18, %v394_v16  ;;  %v544_v35 = vadd.f32 %v5554_v18, %v396_v9  ;;  %v541_v61 = vadd.f32 %v5554_v18, %v393_v15  ;;  %v543_v13 = vadd.f32 %v5554_v18, %v395_v19 }
  0x8c   :  { %v5590_v14 = vpop.permute.xlu0 %62  ;;  %v546_v11 = vadd.f32 %v5554_v18, %v398_v23  ;;  %v548_v44 = vadd.f32 %v5554_v18, %v400_v53  ;;  %v545_v10 = vadd.f32 %v5554_v18, %v397_v22  ;;  %v547_v34 = vadd.f32 %v5554_v18, %v399_v63 }
  0x8d   :  { %v5596_v1 = vpop.permute.xlu1 %642  ;;  %v458_v16 = vmul.f32 %v5320_v28, %v5590_v14  ;;  %v460_v9 = vmul.f32 %v5329_v33, %v5590_v14  ;;  %v457_v15 = vmul.f32 %v5339_v41, %v5590_v14  ;;  %v5606_v19 = vmul.f32 %v5354_v48, %v5590_v14 }
  0x8e   :  { %v974_v23 = vmul.f32 %v5345_v45, %v5596_v1  ;;  %v976_v63 = vmul.f32 %v5348_v46, %v5596_v1  ;;  %v973_v53 = vmul.f32 %v5351_v47, %v5596_v1  ;;  %v975_v22 = vmul.f32 %v5357_v49, %v5596_v1 }
  0x8f   :  { %v978_v62 = vmul.f32 %v5363_v51, %v5596_v1  ;;  %v980_v39 = vmul.f32 %v5373_v55, %v5596_v1  ;;  %v977_v43 = vmul.f32 %v5382_v58, %v5596_v1  ;;  %v979_v38 = vmul.f32 %v5385_v59, %v5596_v1 }
  0x90   :  { %v1102_v42 = vadd.f32 %v974_v23, %v542_v5  ;;  %v1104_v37 = vadd.f32 %v976_v63, %v544_v35  ;;  %v1101_v40 = vadd.f32 %v973_v53, %v541_v61  ;;  %v1103_v32 = vadd.f32 %v975_v22, %v543_v13 }
  0x91   :  { %v5624_v36 = vpop.permute.xlu0 %638  ;;  %v1106_v29 = vadd.f32 %v978_v62, %v546_v11  ;;  %v5626_v31 = vadd.f32 %v980_v39, %v548_v44  ;;  %v5628_v27 = vadd.f32 %v977_v43, %v545_v10  ;;  %v5630_v30 = vadd.f32 %v979_v38, %v547_v34 }
  0x92   :  { %v5632_v12 = vpop.permute.xlu1 %57  ;;  %v942_v26 = vmul.f32 %v5345_v45, %v5624_v36  ;;  %4667 = vtanh.f32 %v1102_v42  ;;  %v944_v35 = vmul.f32 %v5348_v46, %v5624_v36  ;;  %v941_v13 = vmul.f32 %v5351_v47, %v5624_v36 }
  0x93   :  { %4669 = vtanh.f32 %v1104_v37  ;;  %v943_v11 = vmul.f32 %v5357_v49, %v5624_v36  ;;  %v426_v38 = vmul.f32 %v5320_v28, %v5632_v12  ;;  %v428_v39 = vmul.f32 %v5329_v33, %v5632_v12 }
  0x94   :  { %v1070_v43 = vadd.f32 %v942_v26, %v510_v17  ;;  %v1072_v10 = vadd.f32 %v944_v35, %v512_v21  ;;  %v1069_v62 = vadd.f32 %v941_v13, %v509_v20  ;;  %4671 = vtanh.f32 %v1101_v40 }
  0x95   :  { %v5646_v42 = vpop.permute.xlu0 %646  ;;  %v1071_v34 = vadd.f32 %v943_v11, %v511_v7  ;;  %4673 = vtanh.f32 %v1103_v32  ;;  %v425_v37 = vmul.f32 %v5339_v41, %v5632_v12  ;;  %v427_v44 = vmul.f32 %v5354_v48, %v5632_v12 }
  0x96   :  { %v5652_v61 = vpop.permute.xlu1 %501  ;;  %4675 = vtanh.f32 %v1070_v43  ;;  %v1006_v28 = vmul.f32 %v5345_v45, %v5646_v42  ;;  %v1008_v17 = vmul.f32 %v5348_v46, %v5646_v42  ;;  %v1005_v20 = vmul.f32 %v5351_v47, %v5646_v42 }
  0x97   :  { %4677 = vtanh.f32 %v1072_v10  ;;  %v574_v21 = vadd.f32 %v5652_v61, %v426_v38  ;;  %v576_v33 = vadd.f32 %v5652_v61, %v428_v39  ;;  %v573_v41 = vadd.f32 %v5652_v61, %v425_v37 }
  0x98   :  { %4679 = vtanh.f32 %v1069_v62  ;;  %v575_v48 = vadd.f32 %v5652_v61, %v427_v44  ;;  %v1007_v26 = vmul.f32 %v5357_v49, %v5646_v42  ;;  %v946_v32 = vmul.f32 %v5363_v51, %v5624_v36 }
  0x99   :  { %4681 = vtanh.f32 %v1071_v34  ;;  %v1134_v40 = vadd.f32 %v1006_v28, %v574_v21  ;;  %v1136_v5 = vadd.f32 %v1008_v17, %v576_v33  ;;  %v1133_v7 = vadd.f32 %v1005_v20, %v573_v41 }
  0x9a   :  { %v5668_v23 = vpop.permute.xlu1 %506  ;;  %v1135_v63 = vadd.f32 %v1007_v26, %v575_v48  ;;  %v1074_v53 = vadd.f32 %v946_v32, %v5559_v6  ;;  %4683 = vtanh.f32 %v1106_v29  ;;  %v948_v22 = vmul.f32 %v5373_v55, %v5624_v36 }
  0x9b   :  { %v606_v35 = vadd.f32 %v5668_v23, %v458_v16  ;;  %4685 = vtanh.f32 %v1134_v40  ;;  %v608_v13 = vadd.f32 %v5668_v23, %v460_v9  ;;  %v605_v11 = vadd.f32 %v5668_v23, %v457_v15 }
  0x9c   :  { %v4668_v38 = vpop.eup %4667  ;;  %4687 = vtanh.f32 %v1136_v5  ;;  %v607_v39 = vadd.f32 %v5668_v23, %v5606_v19  ;;  %v1076_v43 = vadd.f32 %v948_v22, %v5562_v0  ;;  %v945_v29 = vmul.f32 %v5382_v58, %v5624_v36 }
  0x9d   :  { %v4670_v6 = vpop.eup %4669  ;;  %4689 = vtanh.f32 %v1133_v7  ;;  %v947_v16 = vmul.f32 %v5385_v59, %v5624_v36  ;;  %v430_v9 = vmul.f32 %v5360_v50, %v5632_v12  ;;  %v462_v15 = vmul.f32 %v5360_v50, %v5590_v14 }
  0x9e   :  { %v4672_v10 = vpop.eup %4671  ;;  %4691 = vtanh.f32 %v1135_v63  ;;  %v1073_v19 = vadd.f32 %v945_v29, %v5565_v52  ;;  %v1010_v0 = vmul.f32 %v5363_v51, %v5646_v42  ;;  %v432_v62 = vmul.f32 %v5370_v54, %v5632_v12 }
  0x9f   :  { %v4674_v34 = vpop.eup %4673  ;;  %v5692_v37 = vpop.permute.xlu1 %650  ;;  %4693 = vtanh.f32 %v1074_v53  ;;  %v1075_v44 = vadd.f32 %v947_v16, %v5568_v8  ;;  %v578_v28 = vadd.f32 %v5652_v61, %v430_v9  ;;  %v610_v50 = vadd.f32 %v5668_v23, %v462_v15 }
  0xa0   :  { %v4676_v17 = vpop.eup %4675  ;;  %v1038_v52 = vmul.f32 %v5345_v45, %v5692_v37  ;;  %v1040_v20 = vmul.f32 %v5348_v46, %v5692_v37  ;;  %v1037_v21 = vmul.f32 %v5351_v47, %v5692_v37  ;;  %v1039_v33 = vmul.f32 %v5357_v49, %v5692_v37 }
  0xa1   :  { %v4678_v41 = vpop.eup %4677  ;;  %v4398_v48 = vpack.c.bf16 %v4668_v38, %v4676_v17  ;;  %4695 = vtanh.f32 %v1076_v43  ;;  %v1042_v8 = vmul.f32 %v5363_v51, %v5692_v37  ;;  %v1138_v26 = vadd.f32 %v1010_v0, %v578_v28 }
  0xa2   :  { %v4680_v32 = vpop.eup %4679  ;;  %v4406_v40 = vpack.c.bf16 %v4670_v6, %v4678_v41  ;;  %v1166_v5 = vadd.f32 %v1038_v52, %v606_v35  ;;  %v1168_v45 = vadd.f32 %v1040_v20, %v608_v13  ;;  %v1165_v7 = vadd.f32 %v1037_v21, %v605_v11 }
  0xa3   :  { %v4682_v63 = vpop.eup %4681  ;;  %4399 = vmatprep.subr.bf16.mxu0 %v4398_v48  ;;  %v4400_v46 = vpack.c.bf16 %v4672_v10, %v4680_v32  ;;  %v1167_v53 = vadd.f32 %v1039_v33, %v607_v39  ;;  %4697 = vtanh.f32 %v5626_v31  ;;  %v1170_v47 = vadd.f32 %v1042_v8, %v610_v50 }
  0xa4   :  { %v5708_v49 = vpop.eup %4683  ;;  %4407 = vmatprep.subr.bf16.mxu1 %v4406_v40  ;;  %v4408_v22 = vpack.c.bf16 %v4674_v34, %v4682_v63  ;;  %4699 = vtanh.f32 %v1166_v5  ;;  %v464_v51 = vmul.f32 %v5370_v54, %v5590_v14  ;;  %v580_v38 = vadd.f32 %v5652_v61, %v432_v62 }
  0xa5   :  { %v4686_v35 = vpop.eup %4685  ;;  %4401 = vmatpush1.bf16.msra.mxu0 %v4400_v46  ;;  %4701 = vtanh.f32 %v1168_v45  ;;  %v1012_v13 = vmul.f32 %v5373_v55, %v5646_v42  ;;  %v1044_v31 = vmul.f32 %v5373_v55, %v5692_v37  ;;  %v429_v11 = vmul.f32 %v5376_v56, %v5632_v12 }
  0xa6   :  { %v4688_v39 = vpop.eup %4687  ;;  %4409 = vmatpush1.bf16.msra.mxu1 %v4408_v22  ;;  %4703 = vtanh.f32 %v1165_v7  ;;  %v612_v43 = vadd.f32 %v5668_v23, %v464_v51  ;;  %v461_v54 = vmul.f32 %v5376_v56, %v5590_v14  ;;  %v1009_v29 = vmul.f32 %v5382_v58, %v5646_v42 }
  0xa7   :  { %v5724_v6 = vpop.eup %4689  ;;  %4705 = vtanh.f32 %v1167_v53  ;;  %v1140_v16 = vadd.f32 %v1012_v13, %v580_v38  ;;  %v577_v55 = vadd.f32 %v5652_v61, %v429_v11  ;;  %v1041_v9 = vmul.f32 %v5382_v58, %v5692_v37 }
  0xa8   :  { %v5729_v15 = vpop.eup %4691  ;;  %4707 = vtanh.f32 %v1073_v19  ;;  %v1172_v10 = vadd.f32 %v1044_v31, %v612_v43  ;;  %v609_v0 = vadd.f32 %v5668_v23, %v461_v54  ;;  %v431_v56 = vmul.f32 %v5379_v57, %v5632_v12  ;;  %v6904_v43 = vld [vmem:[#allocation15_spill] sm:$0xff] }
  0xa9   :  { %v4694_v62 = vpop.eup %4693  ;;  %4709 = vtanh.f32 %v5628_v27  ;;  %v1137_v34 = vadd.f32 %v1009_v29, %v577_v55  ;;  %v463_v28 = vmul.f32 %v5379_v57, %v5590_v14  ;;  %v1011_v50 = vmul.f32 %v5385_v59, %v5646_v42  ;;  %v1329_v29 = vld [vmem:[%s6811_s4] sm:$0xff] }
  0xaa   :  { %v4414_v58 = vpack.c.bf16 %v5708_v49, %v4694_v62  ;;  %4711 = vtanh.f32 %v1075_v44  ;;  %v1169_v19 = vadd.f32 %v1041_v9, %v609_v0  ;;  %v579_v17 = vadd.f32 %v5652_v61, %v431_v56  ;;  %1335 = vperm.xlu1 %4665, %v1329_v29  }
  0xab   :  { %v4696_v52 = vpop.eup %4695  ;;  %4713 = vtanh.f32 %v5630_v30  ;;  %v611_v20 = vadd.f32 %v5668_v23, %v463_v28  ;;  %v1043_v27 = vmul.f32 %v5385_v59, %v5692_v37  ;;  %v370_v57 = vmul.f32 %v5388_v60, %v5520_v4 }
  0xac   :  { %4715 = vtanh.f32 %v1138_v26  ;;  %v1139_v21 = vadd.f32 %v1011_v50, %v579_v17  ;;  %v402_v44 = vmul.f32 %v5388_v60, %v5556_v2  ;;  %v950_v33 = vmul.f32 %v5415_v25, %v5624_v36  ;;  %v6906_v17 = vld [vmem:[#allocation17_spill] sm:$0xff] }
  0xad   :  { %v4698_v41 = vpop.eup %4697  ;;  %4717 = vtanh.f32 %v1170_v47  ;;  %v1171_v48 = vadd.f32 %v1043_v27, %v611_v20  ;;  %v518_v30 = vadd.f32 %v5518_v24, %v370_v57  ;;  %v982_v8 = vmul.f32 %v5415_v25, %v5596_v1 }
  0xae   :  { %v4700_v59 = vpop.eup %4699  ;;  %v4422_v32 = vpack.c.bf16 %v4698_v41, %v4696_v52  ;;  %4719 = vtanh.f32 %v1140_v16  ;;  %v550_v26 = vadd.f32 %v5554_v18, %v402_v44  ;;  %v372_v40 = vmul.f32 %v5399_v3, %v5520_v4  ;;  %v5775_v16 = vld [vmem:[%s6810_s3] sm:$0xff]  ;;  %v5796_v44 = vld [vmem:[%s6810_s3 + $0x8] sm:$0xff] }
  0xaf   :  { %v4702_v5 = vpop.eup %4701  ;;  %v4402_v45 = vpack.c.bf16 %v4700_v59, %v4686_v35  ;;  %4721 = vtanh.f32 %v1172_v10  ;;  %v1078_v7 = vadd.f32 %v950_v33, %v518_v30  ;;  %v404_v63 = vmul.f32 %v5399_v3, %v5556_v2  ;;  %v6903_v35 = vld [vmem:[#allocation16_spill] sm:$0xff] }
  0xb0   :  { %v4704_v46 = vpop.eup %4703  ;;  %v4410_v53 = vpack.c.bf16 %v4702_v5, %v4688_v39  ;;  %4723 = vtanh.f32 %v1137_v34  ;;  %v1110_v47 = vadd.f32 %v982_v8, %v550_v26  ;;  %v520_v49 = vadd.f32 %v5518_v24, %v372_v40 }
  0xb1   :  { %v4706_v22 = vpop.eup %4705  ;;  %4403 = vmatprep.subr.bf16.mxu0 %v4402_v45  ;;  %v4404_v51 = vpack.c.bf16 %v4704_v46, %v5724_v6  ;;  %4725 = vtanh.f32 %v1169_v19  ;;  %v552_v38 = vadd.f32 %v5554_v18, %v404_v63  ;;  %v952_v13 = vmul.f32 %v6903_v35, %v5624_v36 }
  0xb2   :  { %v4708_v31 = vpop.eup %4707  ;;  %4411 = vmatprep.subr.bf16.mxu1 %v4410_v53  ;;  %v4412_v11 = vpack.c.bf16 %v4706_v22, %v5729_v15  ;;  %4727 = vtanh.f32 %v1139_v21  ;;  %v984_v39 = vmul.f32 %v6903_v35, %v5596_v1  ;;  %v369_v54 = vmul.f32 %v6904_v43, %v5520_v4  ;;  %v6905_v15 = vld [vmem:[#allocation19_spill] sm:$0xff] }
  0xb3   :  { %v4710_v6 = vpop.eup %4709  ;;  %4405 = vmatpush1.bf16.msra.mxu0 %v4404_v51  ;;  %4729 = vtanh.f32 %v1171_v48  ;;  %v1080_v55 = vadd.f32 %v952_v13, %v520_v49  ;;  %v401_v9 = vmul.f32 %v6904_v43, %v5556_v2  ;;  %v949_v10 = vmul.f32 %v6905_v15, %v5624_v36  ;;  %v6907_v48 = vld [vmem:[#allocation20_spill] sm:$0xff]  ;;  %v1330_v13 = vld [vmem:[%s6811_s4 + $0x8] sm:$0xff] }
  0xb4   :  { %v4712_v0 = vpop.eup %4711  ;;  %4413 = vmatpush1.bf16.msra.mxu1 %v4412_v11  ;;  %4415 = vmatprep.subr.bf16.mxu0 %v4414_v58  ;;  %v4416_v56 = vpack.c.bf16 %v4710_v6, %v4708_v31  ;;  %4731 = vtanh.f32 %v1078_v7  ;;  %v1112_v62 = vadd.f32 %v984_v39, %v552_v38  ;;  %v517_v34 = vadd.f32 %v5518_v24, %v369_v54  ;;  %v5828_v39 = vld [vmem:[%s6810_s3 + $0x10] sm:$0xff] }
  0xb5   :  { %v4714_v28 = vpop.eup %4713  ;;  %4423 = vmatprep.subr.bf16.mxu1 %v4422_v32  ;;  %4733 = vtanh.f32 %v1110_v47  ;;  %v549_v50 = vadd.f32 %v5554_v18, %v401_v9  ;;  %v981_v19 = vmul.f32 %v6905_v15, %v5596_v1  ;;  %v371_v52 = vmul.f32 %v6906_v17, %v5520_v4  ;;  %1340 = vperm.xlu0 %4666, %v1330_v13  }
  0xb6   :  { %v4716_v20 = vpop.eup %4715  ;;  %4318 = vmatmul.mubr.msk.f32.vlgmr.msra.gmra.mrb[0].mxu0 %vm1353_vm0, %v5775_v16  ;;  %v4424_v58 = vpack.c.bf16 %v4714_v28, %v4712_v0  ;;  %4735 = vtanh.f32 %v1080_v55  ;;  %v1077_v27 = vadd.f32 %v949_v10, %v517_v34  ;;  %v403_v57 = vmul.f32 %v6906_v17, %v5556_v2 }
  0xb7   :  { %v4718_v21 = vpop.eup %4717  ;;  %4322 = vmatmul.mubr.msk.f32.vlgmr.msra.gmra.mrb[0].mxu1 %vm1353_vm0, %v5775_v16  ;;  %4417 = vmatpush1.bf16.msra.mxu0 %v4416_v56  ;;  %4737 = vtanh.f32 %v1112_v62  ;;  %v1109_v33 = vadd.f32 %v981_v19, %v549_v50  ;;  %v519_v41 = vadd.f32 %v5518_v24, %v371_v52  ;;  %v951_v30 = vmul.f32 %v6907_v48, %v5624_v36  ;;  %v1331_v52 = vld [vmem:[%s6811_s4 + $0x10] sm:$0xff] }
  0xb8   :  { %v4720_v8 = vpop.eup %4719  ;;  %4425 = vmatpush1.bf16.msra.mxu1 %v4424_v58  ;;  %v4418_v59 = vpack.c.bf16 %v4718_v21, %v4716_v20  ;;  %v6908_v32 = vmov 0.0   ;;  %4739 = vtanh.f32 %v1077_v27  ;;  %v551_v26 = vadd.f32 %v5554_v18, %v403_v57  ;;  %v5859_v27 = vld [vmem:[%s6810_s3 + $0x18] sm:$0xff]  ;;  %1345 = vperm.xlu1 %4665, %v1331_v52  }
  0xb9   :  { %1436 = vmatprep.mubr.f32.mxu0 %v6908_v32  ;;  %v983_v40 = vmul.f32 %v6907_v48, %v5596_v1  ;;  %v4722_v5 = vpop.eup %4721  ;;  %1525 = vmatprep.mubr.f32.mxu1 %v6908_v32  ;;  %4741 = vtanh.f32 %v1109_v33  ;;  %v1079_v45 = vadd.f32 %v951_v30, %v519_v41  ;;  %v434_v7 = vmul.f32 %v5388_v60, %v5632_v12 }
  0xba   :  { %v466_v63 = vmul.f32 %v5388_v60, %v5590_v14  ;;  %v4724_v46 = vpop.eup %4723  ;;  %4419 = vmatprep.subr.bf16.mxu0 %v4418_v59  ;;  %v4426_v53 = vpack.c.bf16 %v4722_v5, %v4720_v8  ;;  %4319 = vmatmul.mubr.msk.f32.gmra.mrb[2].mxu0 %vm1353_vm0, %v5796_v44  ;;  %v1014_v49 = vmul.f32 %v5415_v25, %v5646_v42 }
  0xbb   :  { %v1111_v47 = vadd.f32 %v983_v40, %v551_v26  ;;  %v4726_v22 = vpop.eup %4725  ;;  %4323 = vmatmul.mubr.msk.f32.gmra.mrb[2].mxu1 %vm1353_vm0, %v5796_v44  ;;  %1442 = vmatprep.mubr.f32.mxu0 %v6908_v32  ;;  %4743 = vtanh.f32 %v1079_v45  ;;  %v582_v51 = vadd.f32 %v5652_v61, %v434_v7  ;;  %v1046_v38 = vmul.f32 %v5415_v25, %v5692_v37 }
  0xbc   :  { %v614_v60 = vadd.f32 %v5668_v23, %v466_v63  ;;  %v4728_v31 = vpop.eup %4727  ;;  %4427 = vmatprep.subr.bf16.mxu1 %v4426_v53  ;;  %v4420_v11 = vpack.c.bf16 %v4726_v22, %v4724_v46  ;;  %1531 = vmatprep.mubr.f32.mxu1 %v6908_v32  ;;  %v436_v54 = vmul.f32 %v5399_v3, %v5632_v12  ;;  %v1332_v63 = vld [vmem:[%s6811_s4 + $0x18] sm:$0xff]  ;;  %v6909_v53 = vld [vmem:[#allocation18_spill] sm:$0xff] }
  0xbd   :  { %4745 = vtanh.f32 %v1111_v47  ;;  %v468_v25 = vmul.f32 %v5399_v3, %v5590_v14  ;;  %v4730_v29 = vpop.eup %4729  ;;  %v1142_v6 = vadd.f32 %v1014_v49, %v582_v51  ;;  %v1016_v9 = vmul.f32 %v6903_v35, %v5646_v42  ;;  %1350 = vperm.xlu1 %4665, %v1332_v63  }
  0xbe   :  { %v1174_v55 = vadd.f32 %v1046_v38, %v614_v60  ;;  %v1048_v10 = vmul.f32 %v6903_v35, %v5692_v37  ;;  %v4732_v0 = vpop.eup %4731  ;;  %4421 = vmatpush1.bf16.msra.mxu0 %v4420_v11  ;;  %v4428_v56 = vpack.c.bf16 %v4730_v29, %v4728_v31  ;;  %v584_v62 = vadd.f32 %v5652_v61, %v436_v54  ;;  %v6910_v60 = vld [vmem:[#allocation22_spill] sm:$0xff] }
  0xbf   :  { %v616_v34 = vadd.f32 %v5668_v23, %v468_v25  ;;  %v433_v3 = vmul.f32 %v6904_v43, %v5632_v12  ;;  %v4734_v28 = vpop.eup %4733  ;;  %4320 = vmatmul.mubr.msk.f32.gmra.mrb[4].mxu0 %vm1353_vm0, %v5828_v39  ;;  %4324 = vmatmul.mubr.msk.f32.gmra.mrb[4].mxu1 %vm1353_vm0, %v5828_v39  ;;  %4747 = vtanh.f32 %v1142_v6  ;;  %v465_v35 = vmul.f32 %v6904_v43, %v5590_v14  ;;  %v6911_v6 = vld [vmem:[#allocation21_spill] sm:$0xff] }
  0xc0   :  { %v1013_v50 = vmul.f32 %v6905_v15, %v5646_v42  ;;  %v1045_v19 = vmul.f32 %v6905_v15, %v5692_v37  ;;  %v4736_v20 = vpop.eup %4735  ;;  %4429 = vmatpush1.bf16.msra.mxu1 %v4428_v56  ;;  %v4430_v58 = vpack.c.bf16 %v4734_v28, %v4732_v0  ;;  %1448 = vmatprep.mubr.f32.mxu0 %v6908_v32  ;;  %4749 = vtanh.f32 %v1174_v55  ;;  %v6912_v0 = vld [vmem:[#allocation26_spill] sm:$0xff] }
  0xc1   :  { %v1144_v43 = vadd.f32 %v1016_v9, %v584_v62  ;;  %v1176_v57 = vadd.f32 %v1048_v10, %v616_v34  ;;  %v4738_v21 = vpop.eup %4737  ;;  %1537 = vmatprep.mubr.f32.mxu1 %v6908_v32  ;;  %v581_v15 = vadd.f32 %v5652_v61, %v433_v3  ;;  %v613_v33 = vadd.f32 %v5668_v23, %v465_v35 }
  0xc2   :  { %v435_v41 = vmul.f32 %v6906_v17, %v5632_v12  ;;  %v467_v30 = vmul.f32 %v6906_v17, %v5590_v14  ;;  %v4740_v8 = vpop.eup %4739  ;;  %4431 = vmatprep.subr.bf16.mxu0 %v4430_v58  ;;  %v4438_v59 = vpack.c.bf16 %v4738_v21, %v4736_v20  ;;  %v1015_v26 = vmul.f32 %v6907_v48, %v5646_v42 }
  0xc3   :  { %4751 = vtanh.f32 %v1144_v43  ;;  %v1047_v40 = vmul.f32 %v6907_v48, %v5692_v37  ;;  %v4742_v5 = vpop.eup %4741  ;;  %4321 = vmatmul.mubr.msk.f32.gmra.mrb[6].mxu0 %vm1353_vm0, %v5859_v27  ;;  %4325 = vmatmul.mubr.msk.f32.gmra.mrb[6].mxu1 %vm1353_vm0, %v5859_v27  ;;  %v1141_v17 = vadd.f32 %v1013_v50, %v581_v15  ;;  %v1173_v45 = vadd.f32 %v1045_v19, %v613_v33  ;;  %v6913_v19 = vld [vmem:[#allocation23_spill] sm:$0xff] }
  0xc4   :  { %4753 = vtanh.f32 %v1176_v57  ;;  %v583_v7 = vadd.f32 %v5652_v61, %v435_v41  ;;  %4439 = vmatprep.subr.bf16.mxu1 %v4438_v59  ;;  %1608 = vmatprep.mubr.f32.mxu0 %v6908_v32  ;;  %v4432_v48 = vpack.c.bf16 %v4742_v5, %v4740_v8  ;;  %v615_v46 = vadd.f32 %v5668_v23, %v467_v30  ;;  %v6914_v57 = vld [vmem:[#allocation27_spill] sm:$0xff] }
  0xc5   :  { %v374_v47 = vmul.f32 %v6909_v53, %v5520_v4  ;;  %v4744_v49 = vpop.eup %4743  ;;  %1697 = vmatprep.mubr.f32.mxu1 %v6908_v32  ;;  %4755 = vtanh.f32 %v1141_v17  ;;  %v406_v51 = vmul.f32 %v6909_v53, %v5556_v2  ;;  %v954_v38 = vmul.f32 %v6910_v60, %v5624_v36 }
  0xc6   :  { %v1143_v22 = vadd.f32 %v1015_v26, %v583_v7  ;;  %4757 = vtanh.f32 %v1173_v45  ;;  %v1175_v31 = vadd.f32 %v1047_v40, %v615_v46  ;;  %v986_v54 = vmul.f32 %v6910_v60, %v5596_v1  ;;  %v6915_v26 = vld [vmem:[#allocation24_spill] sm:$0xff] }
  0xc7   :  { %v4746_v13 = vpop.eup %4745  ;;  %v522_v11 = vadd.f32 %v5518_v24, %v374_v47  ;;  %4326 = vmatmul.mubr.msk.f32.vlgmr.msra.gmra.mrb[8].mxu0 %vm1353_vm0, %v5775_v16  ;;  %4330 = vmatmul.mubr.msk.f32.vlgmr.msra.gmra.mrb[8].mxu1 %vm1353_vm0, %v5775_v16  ;;  %v554_v29 = vadd.f32 %v5554_v18, %v406_v51  ;;  %v376_v55 = vmul.f32 %v6911_v6, %v5520_v4  ;;  %v6916_v7 = vld [vmem:[#allocation28_spill] sm:$0xff] }
  0xc8   :  { %v4440_v25 = vpack.c.bf16 %v4746_v13, %v4744_v49  ;;  %4759 = vtanh.f32 %v1143_v22  ;;  %4433 = vmatpush1.bf16.msra.mxu0 %v4432_v48  ;;  %1614 = vmatprep.mubr.f32.mxu0 %v6908_v32  ;;  %v408_v10 = vmul.f32 %v6911_v6, %v5556_v2  ;;  %v956_v56 = vmul.f32 %v6912_v0, %v5624_v36 }
  0xc9   :  { %4761 = vtanh.f32 %v1175_v31  ;;  %v1082_v9 = vadd.f32 %v954_v38, %v522_v11  ;;  %v4748_v62 = vpop.eup %4747  ;;  %1703 = vmatprep.mubr.f32.mxu1 %v6908_v32  ;;  %v1114_v34 = vadd.f32 %v986_v54, %v554_v29  ;;  %v524_v3 = vadd.f32 %v5518_v24, %v376_v55 }
  0xca   :  { %4441 = vmatpush1.bf16.msra.mxu1 %v4440_v25  ;;  %v988_v28 = vmul.f32 %v6912_v0, %v5596_v1  ;;  %v4750_v35 = vpop.eup %4749  ;;  %v556_v50 = vadd.f32 %v5554_v18, %v408_v10  ;;  %v373_v52 = vmul.f32 %v6913_v19, %v5520_v4  ;;  %v405_v20 = vmul.f32 %v6913_v19, %v5556_v2 }
  0xcb   :  { %4763 = vtanh.f32 %v1082_v9  ;;  %v4434_v58 = vpack.c.bf16 %v4750_v35, %v4748_v62  ;;  %4327 = vmatmul.mubr.msk.f32.gmra.mrb[10].mxu0 %vm1353_vm0, %v5796_v44  ;;  %4331 = vmatmul.mubr.msk.f32.gmra.mrb[10].mxu1 %vm1353_vm0, %v5796_v44  ;;  %v1084_v43 = vadd.f32 %v956_v56, %v524_v3  ;;  %v953_v21 = vmul.f32 %v6914_v57, %v5624_v36 }
  0xcc   :  { %4765 = vtanh.f32 %v1114_v34  ;;  %v1116_v33 = vadd.f32 %v988_v28, %v556_v50  ;;  %1620 = vmatprep.mubr.f32.mxu0 %v6908_v32  ;;  %1709 = vmatprep.mubr.f32.mxu1 %v6908_v32  ;;  %v521_v41 = vadd.f32 %v5518_v24, %v373_v52  ;;  %v553_v30 = vadd.f32 %v5554_v18, %v405_v20 }
  0xcd   :  { %v4752_v15 = vpop.eup %4751  ;;  %4435 = vmatprep.subr.bf16.mxu0 %v4434_v58  ;;  %4767 = vtanh.f32 %v1084_v43  ;;  %v985_v59 = vmul.f32 %v6914_v57, %v5596_v1  ;;  %v375_v40 = vmul.f32 %v6915_v26, %v5520_v4  ;;  %v407_v5 = vmul.f32 %v6915_v26, %v5556_v2 }
  0xce   :  { %v4754_v8 = vpop.eup %4753  ;;  %4769 = vtanh.f32 %v1116_v33  ;;  %v1081_v45 = vadd.f32 %v953_v21, %v521_v41  ;;  %v955_v63 = vmul.f32 %v6916_v7, %v5624_v36  ;;  %v987_v51 = vmul.f32 %v6916_v7, %v5596_v1 }
  0xcf   :  { %v4442_v17 = vpack.c.bf16 %v4754_v8, %v4752_v15  ;;  %v4756_v48 = vpop.eup %4755  ;;  %4328 = vmatmul.mubr.msk.f32.gmra.mrb[12].mxu0 %vm1353_vm0, %v5828_v39  ;;  %4332 = vmatmul.mubr.msk.f32.gmra.mrb[12].mxu1 %vm1353_vm0, %v5828_v39  ;;  %v1113_v46 = vadd.f32 %v985_v59, %v553_v30  ;;  %v523_v47 = vadd.f32 %v5518_v24, %v375_v40 }
  0xd0   :  { %v555_v49 = vadd.f32 %v5554_v18, %v407_v5  ;;  %v4758_v22 = vpop.eup %4757  ;;  %1626 = vmatprep.mubr.f32.mxu0 %v6908_v32  ;;  %4771 = vtanh.f32 %v1081_v45  ;;  %v438_v38 = vmul.f32 %v6909_v53, %v5632_v12  ;;  %v470_v13 = vmul.f32 %v6909_v53, %v5590_v14  ;;  %1715 = vmatprep.mubr.f32.mxu1 %v6908_v32 }
  0xd1   :  { %4443 = vmatprep.subr.bf16.mxu1 %v4442_v17  ;;  %v4436_v11 = vpack.c.bf16 %v4758_v22, %v4756_v48  ;;  %4773 = vtanh.f32 %v1113_v46  ;;  %v1083_v54 = vadd.f32 %v955_v63, %v523_v47  ;;  %v1018_v25 = vmul.f32 %v6910_v60, %v5646_v42 }
  0xd2   :  { %v4760_v31 = vpop.eup %4759  ;;  %v1115_v55 = vadd.f32 %v987_v51, %v555_v49  ;;  %v586_v9 = vadd.f32 %v5652_v61, %v438_v38  ;;  %v618_v10 = vadd.f32 %v5668_v23, %v470_v13  ;;  %v1050_v56 = vmul.f32 %v6910_v60, %v5692_v37  ;;  %v2919_v38 = vld [vmem:[#allocation2] sm:$0x1] }
  0xd3   :  { %v4762_v29 = vpop.eup %4761  ;;  %4437 = vmatpush1.bf16.msra.mxu0 %v4436_v11  ;;  %4333 = vmatmul.mubr.msk.f32.gmra.mrb[14].mxu1 %vm1353_vm0, %v5859_v27  ;;  %4775 = vtanh.f32 %v1083_v54  ;;  %v440_v62 = vmul.f32 %v6911_v6, %v5632_v12  ;;  %v472_v34 = vmul.f32 %v6911_v6, %v5590_v14  ;;  %v1020_v35 = vmul.f32 %v6912_v0, %v5646_v42  ;;  %v6918_v11 = vld [vmem:[#allocation31_spill] sm:$0xff] }
  0xd4   :  { %v4444_v53 = vpack.c.bf16 %v4762_v29, %v4760_v31  ;;  %4329 = vmatmul.mubr.msk.f32.gmra.mrb[14].mxu0 %vm1353_vm0, %v5859_v27  ;;  %1875 = vmatprep.mubr.f32.mxu1 %v6908_v32  ;;  %4777 = vtanh.f32 %v1115_v55  ;;  %v1146_v60 = vadd.f32 %v1018_v25, %v586_v9  ;;  %v1178_v28 = vadd.f32 %v1050_v56, %v618_v10 }
  0xd5   :  { %v4764_v3 = vpop.eup %4763  ;;  %1786 = vmatprep.mubr.f32.mxu0 %v6908_v32  ;;  %v588_v52 = vadd.f32 %v5652_v61, %v440_v62  ;;  %v620_v6 = vadd.f32 %v5668_v23, %v472_v34  ;;  %v1052_v20 = vmul.f32 %v6912_v0, %v5692_v37  ;;  %v437_v43 = vmul.f32 %v6913_v19, %v5632_v12 }
  0xd6   :  { %v4766_v50 = vpop.eup %4765  ;;  %4445 = vmatpush1.bf16.msra.mxu1 %v4444_v53  ;;  %4779 = vtanh.f32 %v1146_v60  ;;  %v469_v21 = vmul.f32 %v6913_v19, %v5590_v14  ;;  %v1017_v30 = vmul.f32 %v6914_v57, %v5646_v42  ;;  %v1049_v40 = vmul.f32 %v6914_v57, %v5692_v37  ;;  %2922 = vperm.xlu0 %4666, %v2919_v38   ;;  %v6919_v53 = vld [vmem:[#allocation29_spill] sm:$0xff] }
  0xd7   :  { %v4446_v58 = vpack.c.bf16 %v4766_v50, %v4764_v3  ;;  %v4768_v15 = vpop.eup %4767  ;;  %4781 = vtanh.f32 %v1178_v28  ;;  %v1148_v33 = vadd.f32 %v1020_v35, %v588_v52  ;;  %v1180_v41 = vadd.f32 %v1052_v20, %v620_v6  ;;  %v6920_v28 = vld [vmem:[#allocation32_spill] sm:$0xff] }
  0xd8   :  { %v4770_v8 = vpop.eup %4769  ;;  %4334 = vmatmul.mubr.msk.f32.vlgmr.msra.gmra.mrb[16].mxu0 %vm1353_vm0, %v5775_v16  ;;  %v585_v0 = vadd.f32 %v5652_v61, %v437_v43  ;;  %v617_v59 = vadd.f32 %v5668_v23, %v469_v21  ;;  %v439_v5 = vmul.f32 %v6915_v26, %v5632_v12  ;;  %v471_v17 = vmul.f32 %v6915_v26, %v5590_v14  ;;  %v6917_v26 = vld [vmem:[#allocation25_spill] sm:$0xff]  ;;  %v6921_v21 = vld [vmem:[#allocation30_spill] sm:$0xff] }
  0xd9   :  { %4447 = vmatprep.subr.bf16.mxu0 %v4446_v58  ;;  %v4454_v19 = vpack.c.bf16 %v4770_v8, %v4768_v15  ;;  %4338 = vmatmul.mubr.msk.f32.vlgmr.msra.gmra.mrb[16].mxu1 %vm1353_vm0, %v5775_v16  ;;  %4783 = vtanh.f32 %v1148_v33  ;;  %v1019_v57 = vmul.f32 %v6916_v7, %v5646_v42  ;;  %v1051_v22 = vmul.f32 %v6916_v7, %v5692_v37  ;;  %v6922_v8 = vld [vmem:[#allocation35_spill] sm:$0xff] }
  0xda   :  { %1792 = vmatprep.mubr.f32.mxu0 %v6908_v32  ;;  %v4772_v45 = vpop.eup %4771  ;;  %4785 = vtanh.f32 %v1180_v41  ;;  %1881 = vmatprep.mubr.f32.mxu1 %v6908_v32  ;;  %v1145_v63 = vadd.f32 %v1017_v30, %v585_v0  ;;  %v1177_v48 = vadd.f32 %v1049_v40, %v617_v59  ;;  %v587_v47 = vadd.f32 %v5652_v61, %v439_v5 }
  0xdb   :  { %v4774_v46 = vpop.eup %4773  ;;  %4455 = vmatprep.subr.bf16.mxu1 %v4454_v19  ;;  %v619_v49 = vadd.f32 %v5668_v23, %v471_v17  ;;  %v378_v51 = vmul.f32 %v6917_v26, %v5520_v4  ;;  %v410_v31 = vmul.f32 %v6917_v26, %v5556_v2  ;;  %v958_v54 = vmul.f32 %v6918_v11, %v5624_v36 }
  0xdc   :  { %v4448_v13 = vpack.c.bf16 %v4774_v46, %v4772_v45  ;;  %4335 = vmatmul.mubr.msk.f32.gmra.mrb[18].mxu0 %vm1353_vm0, %v5796_v44  ;;  %4787 = vtanh.f32 %v1145_v63  ;;  %v1147_v7 = vadd.f32 %v1019_v57, %v587_v47  ;;  %v990_v56 = vmul.f32 %v6918_v11, %v5596_v1  ;;  %v6923_v63 = vld [vmem:[#allocation33_spill] sm:$0xff]  ;;  %v6924_v46 = vld [vmem:[#allocation36_spill] sm:$0xff] }
  0xdd   :  { %v4776_v25 = vpop.eup %4775  ;;  %4339 = vmatmul.mubr.msk.f32.gmra.mrb[18].mxu1 %vm1353_vm0, %v5796_v44  ;;  %4789 = vtanh.f32 %v1177_v48  ;;  %v1179_v29 = vadd.f32 %v1051_v22, %v619_v49  ;;  %v526_v55 = vadd.f32 %v5518_v24, %v378_v51  ;;  %1798 = vmatprep.mubr.f32.mxu0 %v6908_v32  ;;  %v558_v10 = vadd.f32 %v5554_v18, %v410_v31 }
  0xde   :  { %v4778_v9 = vpop.eup %4777  ;;  %4449 = vmatpush1.bf16.msra.mxu0 %v4448_v13  ;;  %v380_v62 = vmul.f32 %v6919_v53, %v5520_v4  ;;  %v412_v34 = vmul.f32 %v6919_v53, %v5556_v2  ;;  %4791 = vtanh.f32 %v1147_v7  ;;  %v960_v35 = vmul.f32 %v6920_v28, %v5624_v36  ;;  %1887 = vmatprep.mubr.f32.mxu1 %v6908_v32 }
  0xdf   :  { %v4456_v3 = vpack.c.bf16 %v4778_v9, %v4776_v25  ;;  %v1086_v60 = vadd.f32 %v958_v54, %v526_v55  ;;  %4793 = vtanh.f32 %v1179_v29  ;;  %v1118_v52 = vadd.f32 %v990_v56, %v558_v10 }
  0xe0   :  { %v4780_v50 = vpop.eup %4779  ;;  %v528_v6 = vadd.f32 %v5518_v24, %v380_v62  ;;  %v560_v20 = vadd.f32 %v5554_v18, %v412_v34  ;;  %4336 = vmatmul.mubr.msk.f32.gmra.mrb[20].mxu0 %vm1353_vm0, %v5828_v39  ;;  %v992_v43 = vmul.f32 %v6920_v28, %v5596_v1  ;;  %v377_v15 = vmul.f32 %v6921_v21, %v5520_v4 }
  0xe1   :  { %v4782_v58 = vpop.eup %4781  ;;  %4457 = vmatpush1.bf16.msra.mxu1 %v4456_v3  ;;  %4795 = vtanh.f32 %v1086_v60  ;;  %1804 = vmatprep.mubr.f32.mxu0 %v6908_v32  ;;  %v409_v33 = vmul.f32 %v6921_v21, %v5556_v2  ;;  %v957_v0 = vmul.f32 %v6922_v8, %v5624_v36  ;;  %v989_v17 = vmul.f32 %v6922_v8, %v5596_v1 }
  0xe2   :  { %v4450_v41 = vpack.c.bf16 %v4782_v58, %v4780_v50  ;;  %4797 = vtanh.f32 %v1118_v52  ;;  %v1088_v30 = vadd.f32 %v960_v35, %v528_v6  ;;  %4340 = vmatmul.mubr.msk.f32.gmra.mrb[20].mxu1 %vm1353_vm0, %v5828_v39  ;;  %v1120_v40 = vadd.f32 %v992_v43, %v560_v20 }
  0xe3   :  { %v4784_v59 = vpop.eup %4783  ;;  %1893 = vmatprep.mubr.f32.mxu1 %v6908_v32  ;;  %v525_v19 = vadd.f32 %v5518_v24, %v377_v15  ;;  %v557_v5 = vadd.f32 %v5554_v18, %v409_v33  ;;  %v379_v48 = vmul.f32 %v6923_v63, %v5520_v4  ;;  %v411_v57 = vmul.f32 %v6923_v63, %v5556_v2 }
  0xe4   :  { %v4786_v45 = vpop.eup %4785  ;;  %4451 = vmatprep.subr.bf16.mxu0 %v4450_v41  ;;  %4799 = vtanh.f32 %v1088_v30  ;;  %4337 = vmatmul.mubr.msk.f32.gmra.mrb[22].mxu0 %vm1353_vm0, %v5859_v27  ;;  %v959_v47 = vmul.f32 %v6924_v46, %v5624_v36  ;;  %v991_v54 = vmul.f32 %v6924_v46, %v5596_v1  ;;  %v442_v25 = vmul.f32 %v6917_v26, %v5632_v12 }
  0xe5   :  { %v4458_v49 = vpack.c.bf16 %v4786_v45, %v4784_v59  ;;  %4801 = vtanh.f32 %v1120_v40  ;;  %1964 = vmatprep.mubr.f32.mxu0 %v6908_v32  ;;  %v1085_v22 = vadd.f32 %v957_v0, %v525_v19  ;;  %v1117_v51 = vadd.f32 %v989_v17, %v557_v5 }
  0xe6   :  { %v4788_v38 = vpop.eup %4787  ;;  %4341 = vmatmul.mubr.msk.f32.gmra.mrb[22].mxu1 %vm1353_vm0, %v5859_v27  ;;  %v527_v13 = vadd.f32 %v5518_v24, %v379_v48  ;;  %v559_v31 = vadd.f32 %v5554_v18, %v411_v57  ;;  %v474_v29 = vmul.f32 %v6917_v26, %v5590_v14  ;;  %v1022_v55 = vmul.f32 %v6918_v11, %v5646_v42 }
  0xe7   :  { %v4790_v7 = vpop.eup %4789  ;;  %4459 = vmatprep.subr.bf16.mxu1 %v4458_v49  ;;  %2053 = vmatprep.mubr.f32.mxu1 %v6908_v32  ;;  %4803 = vtanh.f32 %v1085_v22  ;;  %v1054_v9 = vmul.f32 %v6918_v11, %v5692_v37  ;;  %v590_v3 = vadd.f32 %v5652_v61, %v442_v25  ;;  %v444_v35 = vmul.f32 %v6919_v53, %v5632_v12 }
  0xe8   :  { %v4452_v10 = vpack.c.bf16 %v4790_v7, %v4788_v38  ;;  %4805 = vtanh.f32 %v1117_v51  ;;  %v1087_v56 = vadd.f32 %v959_v47, %v527_v13  ;;  %v1119_v62 = vadd.f32 %v991_v54, %v559_v31  ;;  %v4792_v34 = vpop.eup %4791  ;;  %v6925_v31 = vld [vmem:[#allocation34_spill] sm:$0xff] }
  0xe9   :  { %v622_v60 = vadd.f32 %v5668_v23, %v474_v29  ;;  %v476_v26 = vmul.f32 %v6919_v53, %v5590_v14  ;;  %v4794_v50 = vpop.eup %4793  ;;  %v1024_v11 = vmul.f32 %v6920_v28, %v5646_v42  ;;  %v1056_v52 = vmul.f32 %v6920_v28, %v5692_v37  ;;  %v6926_v7 = vld [vmem:[#allocation38_spill] sm:$0xff] }
  0xea   :  { %4453 = vmatpush1.bf16.msra.mxu0 %v4452_v10  ;;  %4807 = vtanh.f32 %v1087_v56  ;;  %v441_v6 = vmul.f32 %v6921_v21, %v5632_v12  ;;  %v4460_v58 = vpack.c.bf16 %v4794_v50, %v4792_v34  ;;  %v1150_v43 = vadd.f32 %v1022_v55, %v590_v3 }
  0xeb   :  { %v4796_v20 = vpop.eup %4795  ;;  %4809 = vtanh.f32 %v1119_v62  ;;  %v1182_v15 = vadd.f32 %v1054_v9, %v622_v60  ;;  %v592_v53 = vadd.f32 %v5652_v61, %v444_v35  ;;  %v624_v41 = vadd.f32 %v5668_v23, %v476_v26  ;;  %v6927_v60 = vld [vmem:[#allocation37_spill] sm:$0xff] }
  0xec   :  { %v4798_v33 = vpop.eup %4797  ;;  %v473_v30 = vmul.f32 %v6921_v21, %v5590_v14  ;;  %v589_v0 = vadd.f32 %v5652_v61, %v441_v6  ;;  %4461 = vmatpush1.bf16.msra.mxu1 %v4460_v58  ;;  %4811 = vtanh.f32 %v1150_v43  ;;  %v1021_v59 = vmul.f32 %v6922_v8, %v5646_v42 }
  0xed   :  { %v4462_v28 = vpack.c.bf16 %v4798_v33, %v4796_v20  ;;  %4342 = vmatmul.mubr.msk.f32.vlgmr.msra.gmra.mrb[24].mxu0 %vm1353_vm0, %v5775_v16  ;;  %v1053_v40 = vmul.f32 %v6922_v8, %v5692_v37  ;;  %4813 = vtanh.f32 %v1182_v15  ;;  %v1152_v5 = vadd.f32 %v1024_v11, %v592_v53  ;;  %v6928_v11 = vld [vmem:[#allocation42_spill] sm:$0xff]  ;;  %v6929_v20 = vld [vmem:[#allocation39_spill] sm:$0xff] }
  0xee   :  { %v4800_v19 = vpop.eup %4799  ;;  %v1184_v17 = vadd.f32 %v1056_v52, %v624_v41  ;;  %1970 = vmatprep.mubr.f32.mxu0 %v6908_v32  ;;  %v621_v21 = vadd.f32 %v5668_v23, %v473_v30  ;;  %v1149_v48 = vadd.f32 %v1021_v59, %v589_v0  ;;  %v443_v57 = vmul.f32 %v6923_v63, %v5632_v12 }
  0xef   :  { %v4802_v45 = vpop.eup %4801  ;;  %4463 = vmatprep.subr.bf16.mxu0 %v4462_v28  ;;  %v475_v47 = vmul.f32 %v6923_v63, %v5590_v14  ;;  %v1023_v8 = vmul.f32 %v6924_v46, %v5646_v42  ;;  %4346 = vmatmul.mubr.msk.f32.vlgmr.msra.gmra.mrb[24].mxu1 %vm1353_vm0, %v5775_v16  ;;  %4815 = vtanh.f32 %v1152_v5  ;;  %v1055_v51 = vmul.f32 %v6924_v46, %v5692_v37 }
  0xf0   :  { %v4470_v49 = vpack.c.bf16 %v4802_v45, %v4800_v19  ;;  %v1181_v22 = vadd.f32 %v1053_v40, %v621_v21  ;;  %4817 = vtanh.f32 %v1184_v17  ;;  %2059 = vmatprep.mubr.f32.mxu1 %v6908_v32  ;;  %v591_v63 = vadd.f32 %v5652_v61, %v443_v57  ;;  %v6930_v40 = vld [vmem:[#allocation43_spill] sm:$0xff]  ;;  %v6931_v17 = vld [vmem:[#allocation40_spill] sm:$0xff] }
  0xf1   :  { %v4804_v38 = vpop.eup %4803  ;;  %4343 = vmatmul.mubr.msk.f32.gmra.mrb[26].mxu0 %vm1353_vm0, %v5796_v44  ;;  %v623_v13 = vadd.f32 %v5668_v23, %v475_v47  ;;  %v382_v54 = vmul.f32 %v6925_v31, %v5520_v4  ;;  %4819 = vtanh.f32 %v1149_v48  ;;  %v414_v46 = vmul.f32 %v6925_v31, %v5556_v2 }
  0xf2   :  { %v4806_v25 = vpop.eup %4805  ;;  %4471 = vmatprep.subr.bf16.mxu1 %v4470_v49  ;;  %v962_v29 = vmul.f32 %v6926_v7, %v5624_v36  ;;  %v994_v55 = vmul.f32 %v6926_v7, %v5596_v1  ;;  %1976 = vmatprep.mubr.f32.mxu0 %v6908_v32  ;;  %4821 = vtanh.f32 %v1181_v22  ;;  %v1151_v10 = vadd.f32 %v1023_v8, %v591_v63  ;;  %v6932_v63 = vld [vmem:[#allocation44_spill] sm:$0xff] }
  0xf3   :  { %v4464_v9 = vpack.c.bf16 %v4806_v25, %v4804_v38  ;;  %v1183_v56 = vadd.f32 %v1055_v51, %v623_v13  ;;  %4347 = vmatmul.mubr.msk.f32.gmra.mrb[26].mxu1 %vm1353_vm0, %v5796_v44  ;;  %v530_v34 = vadd.f32 %v5518_v24, %v382_v54  ;;  %v562_v3 = vadd.f32 %v5554_v18, %v414_v46 }
  0xf4   :  { %v4808_v62 = vpop.eup %4807  ;;  %v384_v35 = vmul.f32 %v6927_v60, %v5520_v4  ;;  %v416_v26 = vmul.f32 %v6927_v60, %v5556_v2  ;;  %4823 = vtanh.f32 %v1151_v10  ;;  %v964_v52 = vmul.f32 %v6928_v11, %v5624_v36  ;;  %2065 = vmatprep.mubr.f32.mxu1 %v6908_v32 }
  0xf5   :  { %v4810_v50 = vpop.eup %4809  ;;  %4465 = vmatpush1.bf16.msra.mxu0 %v4464_v9  ;;  %v996_v6 = vmul.f32 %v6928_v11, %v5596_v1  ;;  %v381_v58 = vmul.f32 %v6929_v20, %v5520_v4  ;;  %4825 = vtanh.f32 %v1183_v56  ;;  %v1090_v15 = vadd.f32 %v962_v29, %v530_v34 }
  0xf6   :  { %v4472_v43 = vpack.c.bf16 %v4810_v50, %v4808_v62  ;;  %v1122_v33 = vadd.f32 %v994_v55, %v562_v3  ;;  %4344 = vmatmul.mubr.msk.f32.gmra.mrb[28].mxu0 %vm1353_vm0, %v5828_v39  ;;  %v4812_v53 = vpop.eup %4811  ;;  %v532_v41 = vadd.f32 %v5518_v24, %v384_v35  ;;  %v564_v30 = vadd.f32 %v5554_v18, %v416_v26 }
  0xf7   :  { %1982 = vmatprep.mubr.f32.mxu0 %v6908_v32  ;;  %v413_v0 = vmul.f32 %v6929_v20, %v5556_v2  ;;  %v529_v28 = vadd.f32 %v5518_v24, %v381_v58  ;;  %v4814_v59 = vpop.eup %4813  ;;  %4827 = vtanh.f32 %v1090_v15  ;;  %v961_v19 = vmul.f32 %v6930_v40, %v5624_v36  ;;  %4348 = vmatmul.mubr.msk.f32.gmra.mrb[28].mxu1 %vm1353_vm0, %v5828_v39 }
  0xf8   :  { %4473 = vmatpush1.bf16.msra.mxu1 %v4472_v43  ;;  %v993_v5 = vmul.f32 %v6930_v40, %v5596_v1  ;;  %v383_v21 = vmul.f32 %v6931_v17, %v5520_v4  ;;  %v4466_v45 = vpack.c.bf16 %v4814_v59, %v4812_v53  ;;  %4829 = vtanh.f32 %v1122_v33  ;;  %2071 = vmatprep.mubr.f32.mxu1 %v6908_v32 }
  0xf9   :  { %v1092_v48 = vadd.f32 %v964_v52, %v532_v41  ;;  %v1124_v57 = vadd.f32 %v996_v6, %v564_v30  ;;  %v4816_v47 = vpop.eup %4815  ;;  %v561_v8 = vadd.f32 %v5554_v18, %v413_v0  ;;  %v1089_v49 = vadd.f32 %v961_v19, %v529_v28 }
  0xfa   :  { %4345 = vmatmul.mubr.msk.f32.gmra.mrb[30].mxu0 %vm1353_vm0, %v5859_v27  ;;  %v415_v22 = vmul.f32 %v6931_v17, %v5556_v2  ;;  %v4818_v51 = vpop.eup %4817  ;;  %4467 = vmatprep.subr.bf16.mxu0 %v4466_v45  ;;  %v531_v38 = vadd.f32 %v5518_v24, %v383_v21  ;;  %v963_v13 = vmul.f32 %v6932_v63, %v5624_v36 }
  0xfb   :  { %4831 = vtanh.f32 %v1092_v48  ;;  %2142 = vmatprep.mubr.f32.mxu0 %v6908_v32  ;;  %v995_v54 = vmul.f32 %v6932_v63, %v5596_v1  ;;  %v4820_v25 = vpop.eup %4819  ;;  %v4474_v46 = vpack.c.bf16 %v4818_v51, %v4816_v47  ;;  %v1121_v29 = vadd.f32 %v993_v5, %v561_v8  ;;  %4349 = vmatmul.mubr.msk.f32.gmra.mrb[30].mxu1 %vm1353_vm0, %v5859_v27 }
  0xfc   :  { %4833 = vtanh.f32 %v1124_v57  ;;  %v563_v55 = vadd.f32 %v5554_v18, %v415_v22  ;;  %v4822_v9 = vpop.eup %4821  ;;  %v1091_v10 = vadd.f32 %v963_v13, %v531_v38  ;;  %v446_v56 = vmul.f32 %v6925_v31, %v5632_v12  ;;  %2231 = vmatprep.mubr.f32.mxu1 %v6908_v32  ;;  %v6933_v13 = vld [vmem:[#allocation41_spill] sm:$0xff] }
  0xfd   :  { %4835 = vtanh.f32 %v1089_v49  ;;  %v478_v62 = vmul.f32 %v6925_v31, %v5590_v14  ;;  %4475 = vmatprep.subr.bf16.mxu1 %v4474_v46  ;;  %v4468_v34 = vpack.c.bf16 %v4822_v9, %v4820_v25  ;;  %v1026_v35 = vmul.f32 %v6926_v7, %v5646_v42 }
  0xfe   :  { %4837 = vtanh.f32 %v1121_v29  ;;  %v1123_v3 = vadd.f32 %v995_v54, %v563_v55  ;;  %v4824_v26 = vpop.eup %4823  ;;  %v594_v50 = vadd.f32 %v5652_v61, %v446_v56  ;;  %v1058_v6 = vmul.f32 %v6926_v7, %v5692_v37 }
  0xff   :  { %4839 = vtanh.f32 %v1091_v10  ;;  %v626_v52 = vadd.f32 %v5668_v23, %v478_v62  ;;  %v4826_v58 = vpop.eup %4825  ;;  %4469 = vmatpush1.bf16.msra.mxu0 %v4468_v34  ;;  %v448_v31 = vmul.f32 %v6927_v60, %v5632_v12  ;;  %v480_v43 = vmul.f32 %v6927_v60, %v5590_v14  ;;  %v6212_v34 = vld [vmem:[%s6807_s0 + $0x30] sm:$0xff] }
 0x100   :  { %4841 = vtanh.f32 %v1123_v3  ;;  %v1028_v15 = vmul.f32 %v6928_v11, %v5646_v42  ;;  %v4476_v33 = vpack.c.bf16 %v4826_v58, %v4824_v26  ;;  %v1154_v53 = vadd.f32 %v1026_v35, %v594_v50  ;;  %v6934_v3 = vld [vmem:[#allocation10_spill] sm:$0xff]  ;;  %v6935_v26 = vld [vmem:[#allocation45_spill] sm:$0xff] }
 0x101   :  { %v1186_v41 = vadd.f32 %v1058_v6, %v626_v52  ;;  %v1060_v30 = vmul.f32 %v6928_v11, %v5692_v37  ;;  %v4828_v0 = vpop.eup %4827  ;;  %v596_v7 = vadd.f32 %v5652_v61, %v448_v31  ;;  %v628_v28 = vadd.f32 %v5668_v23, %v480_v43 }
 0x102   :  { %v445_v59 = vmul.f32 %v6929_v20, %v5632_v12  ;;  %v477_v60 = vmul.f32 %v6929_v20, %v5590_v14  ;;  %v4830_v19 = vpop.eup %4829  ;;  %4477 = vmatpush1.bf16.msra.mxu1 %v4476_v33  ;;  %4350 = vmatmul.mubr.msk.f32.vlgmr.msra.gmra.mrb[32].mxu0 %vm1353_vm0, %v5775_v16  ;;  %4843 = vtanh.f32 %v1154_v53  ;;  %v1025_v11 = vmul.f32 %v6930_v40, %v5646_v42 }
 0x103   :  { %v1057_v5 = vmul.f32 %v6930_v40, %v5692_v37  ;;  %v447_v21 = vmul.f32 %v6931_v17, %v5632_v12  ;;  %v4478_v45 = vpack.c.bf16 %v4830_v19, %v4828_v0  ;;  %4845 = vtanh.f32 %v1186_v41  ;;  %2148 = vmatprep.mubr.f32.mxu0 %v6908_v32  ;;  %v6937_v41 = vld [vmem:[#allocation12_spill] sm:$0xff]  ;;  %v6938_v0 = vld [vmem:[#allocation9_spill] sm:$0xff] }
 0x104   :  { %v1156_v48 = vadd.f32 %v1028_v15, %v596_v7  ;;  %v1188_v57 = vadd.f32 %v1060_v30, %v628_v28  ;;  %v593_v47 = vadd.f32 %v5652_v61, %v445_v59  ;;  %v625_v8 = vadd.f32 %v5668_v23, %v477_v60  ;;  %v6936_v15 = vld [vmem:[#allocation11_spill] sm:$0xff] }
 0x105   :  { %v4832_v20 = vpop.eup %4831  ;;  %v479_v49 = vmul.f32 %v6931_v17, %v5590_v14  ;;  %v595_v22 = vadd.f32 %v5652_v61, %v447_v21  ;;  %4479 = vmatprep.subr.bf16.mxu0 %v4478_v45  ;;  %4354 = vmatmul.mubr.msk.f32.vlgmr.msra.gmra.mrb[32].mxu1 %vm1353_vm0, %v5775_v16  ;;  %v1027_v51 = vmul.f32 %v6932_v63, %v5646_v42  ;;  %v6939_v45 = vld [vmem:[#allocation13_spill] sm:$0xff] }
 0x106   :  { %v4834_v40 = vpop.eup %4833  ;;  %4847 = vtanh.f32 %v1156_v48  ;;  %v1059_v38 = vmul.f32 %v6932_v63, %v5692_v37  ;;  %v386_v54 = vmul.f32 %v6933_v13, %v5520_v4  ;;  %2237 = vmatprep.mubr.f32.mxu1 %v6908_v32  ;;  %4351 = vmatmul.mubr.msk.f32.gmra.mrb[34].mxu0 %vm1353_vm0, %v5796_v44  ;;  %v1153_v17 = vadd.f32 %v1025_v11, %v593_v47 }
 0x107   :  { %v4836_v25 = vpop.eup %4835  ;;  %v4486_v46 = vpack.c.bf16 %v4834_v40, %v4832_v20  ;;  %4849 = vtanh.f32 %v1188_v57  ;;  %v1185_v16 = vadd.f32 %v1057_v5, %v625_v8  ;;  %v627_v55 = vadd.f32 %v5668_v23, %v479_v49  ;;  %2154 = vmatprep.mubr.f32.mxu0 %v6908_v32  ;;  %v6940_v57 = vld [vmem:[#allocation14_spill] sm:$0xff] }
 0x108   :  { %v4838_v29 = vpop.eup %4837  ;;  %v1155_v9 = vadd.f32 %v1027_v51, %v595_v22  ;;  %v418_v63 = vmul.f32 %v6933_v13, %v5556_v2  ;;  %v534_v10 = vadd.f32 %v5518_v24, %v386_v54  ;;  %4851 = vtanh.f32 %v1153_v17 }
 0x109   :  { %v4840_v56 = vpop.eup %4839  ;;  %4487 = vmatprep.subr.bf16.mxu1 %v4486_v46  ;;  %v4480_v62 = vpack.c.bf16 %v4838_v29, %v4836_v25  ;;  %v756_v35 = vrot.slane %v6212_v34, %v6934_v3  ;;  %v388_v50 = vmul.f32 %v6935_v26, %v5520_v4  ;;  %4355 = vmatmul.mubr.msk.f32.gmra.mrb[34].mxu1 %vm1353_vm0, %v5796_v44  ;;  %4853 = vtanh.f32 %v1185_v16 }
 0x10a   :  { %v4842_v52 = vpop.eup %4841  ;;  %v1187_v6 = vadd.f32 %v1059_v38, %v627_v55  ;;  %v566_v58 = vadd.f32 %v5554_v18, %v418_v63  ;;  %v420_v31 = vmul.f32 %v6935_v26, %v5556_v2  ;;  %4855 = vtanh.f32 %v1155_v9  ;;  %2243 = vmatprep.mubr.f32.mxu1 %v6908_v32  ;;  %4352 = vmatmul.mubr.msk.f32.gmra.mrb[36].mxu0 %vm1353_vm0, %v5828_v39 }
 0x10b   :  { %4481 = vmatpush1.bf16.msra.mxu0 %v4480_v62  ;;  %v4488_v43 = vpack.c.bf16 %v4842_v52, %v4840_v56  ;;  %v6224_v33 = vrot.slane %v756_v35, %v6936_v15  ;;  %v536_v53 = vadd.f32 %v5518_v24, %v388_v50  ;;  %v764_v30 = vrot.slane %v6212_v34, %v6937_v41 }
 0x10c   :  { %4857 = vtanh.f32 %v1187_v6  ;;  %v568_v44 = vadd.f32 %v5554_v18, %v420_v31  ;;  %v172_v7 = vrot.slane %v6212_v34, %v6938_v0  ;;  %v4844_v28 = vpop.eup %4843  ;;  %2160 = vmatprep.mubr.f32.mxu0 %v6908_v32  ;;  %v752_v19 = vrot.slane %v6212_v34, %v6936_v15 }
 0x10d   :  { %4489 = vmatpush1.bf16.msra.mxu1 %v4488_v43  ;;  %v966_v59 = vmul.f32 %v6224_v33, %v5624_v36  ;;  %v998_v60 = vmul.f32 %v6224_v33, %v5596_v1  ;;  %v4846_v11 = vpop.eup %4845  ;;  %v6243_v5 = vrot.slane %v764_v30, %v6936_v15  ;;  %v180_v48 = vrot.slane %v6212_v34, %v6939_v45 }
 0x10e   :  { %4356 = vmatmul.mubr.msk.f32.gmra.mrb[36].mxu1 %vm1353_vm0, %v5828_v39  ;;  %v6248_v21 = vrot.slane %v172_v7, %v6938_v0  ;;  %v760_v20 = vrot.slane %v6212_v34, %v6940_v57  ;;  %v4482_v47 = vpack.c.bf16 %v4846_v11, %v4844_v28  ;;  %v6256_v22 = vrot.slane %v752_v19, %v6936_v15 }
 0x10f   :  { %v1094_v8 = vadd.f32 %v966_v59, %v534_v10  ;;  %v1126_v49 = vadd.f32 %v998_v60, %v566_v58  ;;  %2249 = vmatprep.mubr.f32.mxu1 %v6908_v32  ;;  %v968_v39 = vmul.f32 %v6243_v5, %v5624_v36  ;;  %v1000_v51 = vmul.f32 %v6243_v5, %v5596_v1 }
 0x110   :  { %v4848_v40 = vpop.eup %4847  ;;  %4353 = vmatmul.mubr.msk.f32.gmra.mrb[38].mxu0 %vm1353_vm0, %v5859_v27  ;;  %v385_v38 = vmul.f32 %v6248_v21, %v5520_v4  ;;  %v417_v54 = vmul.f32 %v6248_v21, %v5556_v2  ;;  %4483 = vmatprep.subr.bf16.mxu0 %v4482_v47  ;;  %v965_v46 = vmul.f32 %v6256_v22, %v5624_v36 }
 0x111   :  { %v4850_v25 = vpop.eup %4849  ;;  %4859 = vtanh.f32 %v1094_v8  ;;  %2320 = vmatprep.mubr.f32.mxu0 %v6908_v32  ;;  %v997_v17 = vmul.f32 %v6256_v22, %v5596_v1  ;;  %v6274_v16 = vrot.slane %v180_v48, %v6938_v0  ;;  %v1096_v55 = vadd.f32 %v968_v39, %v536_v53 }
 0x112   :  { %v4490_v29 = vpack.c.bf16 %v4850_v25, %v4848_v40  ;;  %4861 = vtanh.f32 %v1126_v49  ;;  %v1128_v9 = vadd.f32 %v1000_v51, %v568_v44  ;;  %4357 = vmatmul.mubr.msk.f32.gmra.mrb[38].mxu1 %vm1353_vm0, %v5859_v27  ;;  %v4852_v63 = vpop.eup %4851  ;;  %v533_v10 = vadd.f32 %v5518_v24, %v385_v38  ;;  %v6313_v40 = vld [vmem:[%s6810_s3] sm:$0xff] }
 0x113   :  { %2409 = vmatprep.mubr.f32.mxu1 %v6908_v32  ;;  %v565_v56 = vadd.f32 %v5554_v18, %v417_v54  ;;  %v387_v62 = vmul.f32 %v6274_v16, %v5520_v4  ;;  %v419_v34 = vmul.f32 %v6274_v16, %v5556_v2  ;;  %v4854_v35 = vpop.eup %4853  ;;  %4863 = vtanh.f32 %v1096_v55 }
 0x114   :  { %4491 = vmatprep.subr.bf16.mxu1 %v4490_v29  ;;  %v6286_v50 = vrot.slane %v760_v20, %v6936_v15  ;;  %v450_v27 = vmul.f32 %v6933_v13, %v5632_v12  ;;  %v482_v52 = vmul.f32 %v6933_v13, %v5590_v14  ;;  %v4856_v6 = vpop.eup %4855  ;;  %v4484_v58 = vpack.c.bf16 %v4854_v35, %v4852_v63 }
 0x115   :  { %4865 = vtanh.f32 %v1128_v9  ;;  %v1093_v31 = vadd.f32 %v965_v46, %v533_v10  ;;  %v1125_v43 = vadd.f32 %v997_v17, %v565_v56  ;;  %v535_v44 = vadd.f32 %v5518_v24, %v387_v62  ;;  %v6335_v56 = vld [vmem:[%s6810_s3 + $0x8] sm:$0xff] }
 0x116   :  { %v4858_v53 = vpop.eup %4857  ;;  %v567_v30 = vadd.f32 %v5554_v18, %v419_v34  ;;  %v967_v7 = vmul.f32 %v6286_v50, %v5624_v36  ;;  %v999_v28 = vmul.f32 %v6286_v50, %v5596_v1  ;;  %4485 = vmatpush1.bf16.msra.mxu0 %v4484_v58  ;;  %v598_v13 = vadd.f32 %v5652_v61, %v450_v27  ;;  %v6347_v27 = vld [vmem:[%s6807_s0 + $0x38] sm:$0xff] }
 0x117   :  { %v4492_v59 = vpack.c.bf16 %v4858_v53, %v4856_v6  ;;  %4867 = vtanh.f32 %v1093_v31  ;;  %v630_v60 = vadd.f32 %v5668_v23, %v482_v52  ;;  %v1030_v48 = vmul.f32 %v6224_v33, %v5646_v42 }
 0x118   :  { %4869 = vtanh.f32 %v1125_v43  ;;  %v1095_v19 = vadd.f32 %v967_v7, %v535_v44  ;;  %v1127_v11 = vadd.f32 %v999_v28, %v567_v30  ;;  %v1062_v20 = vmul.f32 %v6224_v33, %v5692_v37  ;;  %v6941_v30 = vld [vmem:[#allocation7_spill] sm:$0xff] }
 0x119   :  { %4493 = vmatpush1.bf16.msra.mxu1 %v4492_v59  ;;  %v452_v47 = vmul.f32 %v6935_v26, %v5632_v12  ;;  %v484_v8 = vmul.f32 %v6935_v26, %v5590_v14  ;;  %v1032_v49 = vmul.f32 %v6243_v5, %v5646_v42  ;;  %4358 = vmatmul.mubr.msk.f32.vlgmr.msra.gmra.mrb[40].mxu0 %vm1353_vm0, %v6313_v40 }
 0x11a   :  { %4871 = vtanh.f32 %v1095_v19  ;;  %v1158_v39 = vadd.f32 %v1030_v48, %v598_v13  ;;  %v1064_v33 = vmul.f32 %v6243_v5, %v5692_v37  ;;  %v449_v51 = vmul.f32 %v6248_v21, %v5632_v12  ;;  %2326 = vmatprep.mubr.f32.mxu0 %v6908_v32  ;;  %v6942_v13 = vld [vmem:[#allocation8_spill] sm:$0xff] }
 0x11b   :  { %v4860_v26 = vpop.eup %4859  ;;  %4873 = vtanh.f32 %v1127_v11  ;;  %v1190_v38 = vadd.f32 %v1062_v20, %v630_v60  ;;  %v600_v54 = vadd.f32 %v5652_v61, %v452_v47  ;;  %v632_v25 = vadd.f32 %v5668_v23, %v484_v8  ;;  %v6372_v11 = vld [vmem:[%s6810_s3 + $0x10] sm:$0xff] }
 0x11c   :  { %v4862_v46 = vpop.eup %4861  ;;  %4362 = vmatmul.mubr.msk.f32.vlgmr.msra.gmra.mrb[40].mxu1 %vm1353_vm0, %v6313_v40  ;;  %4875 = vtanh.f32 %v1158_v39  ;;  %v481_v5 = vmul.f32 %v6248_v21, %v5590_v14  ;;  %v597_v17 = vadd.f32 %v5652_v61, %v449_v51  ;;  %v1029_v29 = vmul.f32 %v6256_v22, %v5646_v42 }
 0x11d   :  { %v4494_v55 = vpack.c.bf16 %v4862_v46, %v4860_v26  ;;  %4877 = vtanh.f32 %v1190_v38  ;;  %v1160_v9 = vadd.f32 %v1032_v49, %v600_v54  ;;  %v1192_v63 = vadd.f32 %v1064_v33, %v632_v25  ;;  %2415 = vmatprep.mubr.f32.mxu1 %v6908_v32  ;;  %v4864_v10 = vpop.eup %4863  ;;  %4359 = vmatmul.mubr.msk.f32.gmra.mrb[42].mxu0 %vm1353_vm0, %v6335_v56 }
 0x11e   :  { %v629_v21 = vadd.f32 %v5668_v23, %v481_v5  ;;  %v1061_v62 = vmul.f32 %v6256_v22, %v5692_v37  ;;  %v1157_v34 = vadd.f32 %v1029_v29, %v597_v17  ;;  %v451_v35 = vmul.f32 %v6274_v16, %v5632_v12  ;;  %2332 = vmatprep.mubr.f32.mxu0 %v6908_v32  ;;  %v6409_v29 = vld [vmem:[%s6810_s3 + $0x18] sm:$0xff] }
 0x11f   :  { %v4866_v52 = vpop.eup %4865  ;;  %4495 = vmatprep.subr.bf16.mxu0 %v4494_v55  ;;  %4879 = vtanh.f32 %v1160_v9  ;;  %v483_v6 = vmul.f32 %v6274_v16, %v5590_v14  ;;  %v1031_v58 = vmul.f32 %v6286_v50, %v5646_v42  ;;  %v1063_v22 = vmul.f32 %v6286_v50, %v5692_v37 }
 0x120   :  { %v4502_v31 = vpack.c.bf16 %v4866_v52, %v4864_v10  ;;  %4881 = vtanh.f32 %v1192_v63  ;;  %4363 = vmatmul.mubr.msk.f32.gmra.mrb[42].mxu1 %vm1353_vm0, %v6335_v56  ;;  %v1189_v43 = vadd.f32 %v1061_v62, %v629_v21  ;;  %v599_v53 = vadd.f32 %v5652_v61, %v451_v35 }
 0x121   :  { %v4868_v44 = vpop.eup %4867  ;;  %4883 = vtanh.f32 %v1157_v34  ;;  %v631_v16 = vadd.f32 %v5668_v23, %v483_v6  ;;  %v192_v7 = vrot.slane %v6347_v27, %v6941_v30  ;;  %v772_v50 = vrot.slane %v6347_v27, %v6934_v3  ;;  %2421 = vmatprep.mubr.f32.mxu1 %v6908_v32  ;;  %4360 = vmatmul.mubr.msk.f32.gmra.mrb[44].mxu0 %vm1353_vm0, %v6372_v11 }
 0x122   :  { %v4870_v28 = vpop.eup %4869  ;;  %4503 = vmatprep.subr.bf16.mxu1 %v4502_v31  ;;  %4885 = vtanh.f32 %v1189_v43  ;;  %v1159_v59 = vadd.f32 %v1031_v58, %v599_v53  ;;  %v200_v60 = vrot.slane %v6347_v27, %v6942_v13  ;;  %v780_v19 = vrot.slane %v6347_v27, %v6937_v41  ;;  %2338 = vmatprep.mubr.f32.mxu0 %v6908_v32 }
 0x123   :  { %v4496_v3 = vpack.c.bf16 %v4870_v28, %v4868_v44  ;;  %v1191_v48 = vadd.f32 %v1063_v22, %v631_v16  ;;  %v6377_v20 = vrot.slane %v192_v7, %v6938_v0  ;;  %v6380_v47 = vrot.slane %v772_v50, %v6936_v15 }
 0x124   :  { %v4872_v8 = vpop.eup %4871  ;;  %4887 = vtanh.f32 %v1159_v59  ;;  %v6384_v41 = vrot.slane %v200_v60, %v6938_v0  ;;  %v6387_v49 = vrot.slane %v780_v19, %v6936_v15  ;;  %4364 = vmatmul.mubr.msk.f32.gmra.mrb[44].mxu1 %vm1353_vm0, %v6372_v11  ;;  %v188_v39 = vrot.slane %v6347_v27, %v6938_v0 }
 0x125   :  { %v4874_v33 = vpop.eup %4873  ;;  %4497 = vmatpush1.bf16.msra.mxu0 %v4496_v3  ;;  %4889 = vtanh.f32 %v1191_v48  ;;  %v390_v51 = vmul.f32 %v6377_v20, %v5520_v4  ;;  %v422_v26 = vmul.f32 %v6377_v20, %v5556_v2  ;;  %v970_v38 = vmul.f32 %v6380_v47, %v5624_v36  ;;  %2427 = vmatprep.mubr.f32.mxu1 %v6908_v32 }
 0x126   :  { %v4876_v54 = vpop.eup %4875  ;;  %v4504_v25 = vpack.c.bf16 %v4874_v33, %v4872_v8  ;;  %v1002_v46 = vmul.f32 %v6380_v47, %v5596_v1  ;;  %v392_v5 = vmul.f32 %v6384_v41, %v5520_v4  ;;  %v424_v17 = vmul.f32 %v6384_v41, %v5556_v2  ;;  %4361 = vmatmul.mubr.msk.f32.gmra.mrb[46].mxu0 %vm1353_vm0, %v6409_v29 }
 0x127   :  { %v4878_v55 = vpop.eup %4877  ;;  %v538_v9 = vadd.f32 %v5518_v24, %v390_v51  ;;  %v570_v63 = vadd.f32 %v5554_v18, %v422_v26  ;;  %v972_v10 = vmul.f32 %v6387_v49, %v5624_v36  ;;  %v1004_v21 = vmul.f32 %v6387_v49, %v5596_v1  ;;  %2498 = vmatprep.mubr.f32.mxu0 %v6908_v32 }
 0x128   :  { %4505 = vmatpush1.bf16.msra.mxu1 %v4504_v25  ;;  %v4498_v62 = vpack.c.bf16 %v4878_v55, %v4876_v54  ;;  %v540_v34 = vadd.f32 %v5518_v24, %v392_v5  ;;  %v572_v35 = vadd.f32 %v5554_v18, %v424_v17  ;;  %v6423_v52 = vrot.slane %v188_v39, %v6938_v0 }
 0x129   :  { %v4880_v6 = vpop.eup %4879  ;;  %v1098_v58 = vadd.f32 %v970_v38, %v538_v9  ;;  %v1130_v22 = vadd.f32 %v1002_v46, %v570_v63  ;;  %4365 = vmatmul.mubr.msk.f32.gmra.mrb[46].mxu1 %vm1353_vm0, %v6409_v29  ;;  %v768_v31 = vrot.slane %v6347_v27, %v6936_v15  ;;  %v196_v43 = vrot.slane %v6347_v27, %v6939_v45 }
 0x12a   :  { %v4882_v53 = vpop.eup %4881  ;;  %4499 = vmatprep.subr.bf16.mxu0 %v4498_v62  ;;  %v1100_v44 = vadd.f32 %v972_v10, %v540_v34  ;;  %v1132_v16 = vadd.f32 %v1004_v21, %v572_v35  ;;  %2587 = vmatprep.mubr.f32.mxu1 %v6908_v32  ;;  %v389_v30 = vmul.f32 %v6423_v52, %v5520_v4 }
 0x12b   :  { %v4884_v7 = vpop.eup %4883  ;;  %v4506_v50 = vpack.c.bf16 %v4882_v53, %v4880_v6  ;;  %4891 = vtanh.f32 %v1098_v58  ;;  %v421_v28 = vmul.f32 %v6423_v52, %v5556_v2  ;;  %v928_v59 = vrot.slane %v768_v31, %v6936_v15 }
 0x12c   :  { %v4886_v13 = vpop.eup %4885  ;;  %4893 = vtanh.f32 %v1130_v22  ;;  %v537_v45 = vadd.f32 %v5518_v24, %v389_v30  ;;  %v6439_v60 = vrot.slane %v196_v43, %v6938_v0  ;;  %v776_v19 = vrot.slane %v6347_v27, %v6940_v57 }
 0x12d   :  { %4507 = vmatprep.subr.bf16.mxu1 %v4506_v50  ;;  %v4500_v3 = vpack.c.bf16 %v4886_v13, %v4884_v7  ;;  %4895 = vtanh.f32 %v1100_v44  ;;  %v569_v48 = vadd.f32 %v5554_v18, %v421_v28  ;;  %v969_v8 = vmul.f32 %v928_v59, %v5624_v36 }
 0x12e   :  { %v4888_v39 = vpop.eup %4887  ;;  %4897 = vtanh.f32 %v1132_v16  ;;  %v1001_v33 = vmul.f32 %v928_v59, %v5596_v1  ;;  %v391_v51 = vmul.f32 %v6439_v60, %v5520_v4  ;;  %v423_v26 = vmul.f32 %v6439_v60, %v5556_v2 }
 0x12f   :  { %v4890_v38 = vpop.eup %4889  ;;  %4501 = vmatpush1.bf16.msra.mxu0 %v4500_v3  ;;  %v1097_v57 = vadd.f32 %v969_v8, %v537_v45  ;;  %v6451_v27 = vrot.slane %v776_v19, %v6936_v15  ;;  %v454_v54 = vmul.f32 %v6377_v20, %v5632_v12  ;;  %v486_v25 = vmul.f32 %v6377_v20, %v5590_v14 }
 0x130   :  { %v4508_v46 = vpack.c.bf16 %v4890_v38, %v4888_v39  ;;  %v1129_v5 = vadd.f32 %v1001_v33, %v569_v48  ;;  %v539_v17 = vadd.f32 %v5518_v24, %v391_v51  ;;  %v571_v4 = vadd.f32 %v5554_v18, %v423_v26 }
 0x131   :  { %4899 = vtanh.f32 %v1097_v57  ;;  %v971_v2 = vmul.f32 %v6451_v27, %v5624_v36  ;;  %v1003_v15 = vmul.f32 %v6451_v27, %v5596_v1  ;;  %v602_v55 = vadd.f32 %v5652_v61, %v454_v54 }
 0x132   :  { %4509 = vmatpush1.bf16.msra.mxu1 %v4508_v46  ;;  %4366 = vmatmul.mubr.msk.f32.vlgmr.msra.gmra.mrb[48].mxu0 %vm1353_vm0, %v6313_v40  ;;  %4901 = vtanh.f32 %v1129_v5  ;;  %v634_v20 = vadd.f32 %v5668_v23, %v486_v25  ;;  %v1034_v24 = vmul.f32 %v6380_v47, %v5646_v42  ;;  %v1066_v18 = vmul.f32 %v6380_v47, %v5692_v37 }
 0x133   :  { %v1099_v9 = vadd.f32 %v971_v2, %v539_v17  ;;  %v1131_v36 = vadd.f32 %v1003_v15, %v571_v4  ;;  %v456_v1 = vmul.f32 %v6384_v41, %v5632_v12  ;;  %v488_v63 = vmul.f32 %v6384_v41, %v5590_v14  ;;  %2504 = vmatprep.mubr.f32.mxu0 %v6908_v32 }
 0x134   :  { %v1162_v10 = vadd.f32 %v1034_v24, %v602_v55  ;;  %v1194_v21 = vadd.f32 %v1066_v18, %v634_v20  ;;  %v1036_v62 = vmul.f32 %v6387_v49, %v5646_v42  ;;  %v1068_v34 = vmul.f32 %v6387_v49, %v5692_v37  ;;  %v6549_v24 = vpop.permute.xlu0 %1340 }
 0x135   :  { %v4892_v35 = vpop.eup %4891  ;;  %4370 = vmatmul.mubr.msk.f32.vlgmr.msra.gmra.mrb[48].mxu1 %vm1353_vm0, %v6313_v40  ;;  %4903 = vtanh.f32 %v1099_v9  ;;  %v604_v47 = vadd.f32 %v5652_v61, %v456_v1  ;;  %v636_v6 = vadd.f32 %v5668_v23, %v488_v63  ;;  %v453_v41 = vmul.f32 %v6423_v52, %v5632_v12 }
 0x136   :  { %v4894_v58 = vpop.eup %4893  ;;  %4905 = vtanh.f32 %v1131_v36  ;;  %2593 = vmatprep.mubr.f32.mxu1 %v6908_v32  ;;  %4367 = vmatmul.mubr.msk.f32.gmra.mrb[50].mxu0 %vm1353_vm0, %v6335_v56  ;;  %v485_v49 = vmul.f32 %v6423_v52, %v5590_v14  ;;  %v1033_v22 = vmul.f32 %v928_v59, %v5646_v42  ;;  %v1065_v31 = vmul.f32 %v928_v59, %v5692_v37 }
 0x137   :  { %v4896_v43 = vpop.eup %4895  ;;  %v4510_v53 = vpack.c.bf16 %v4894_v58, %v4892_v35  ;;  %4907 = vtanh.f32 %v1162_v10  ;;  %v1164_v44 = vadd.f32 %v1036_v62, %v604_v47  ;;  %v1196_v16 = vadd.f32 %v1068_v34, %v636_v6  ;;  %2510 = vmatprep.mubr.f32.mxu0 %v6908_v32 }
 0x138   :  { %v4898_v30 = vpop.eup %4897  ;;  %4909 = vtanh.f32 %v1194_v21  ;;  %v601_v7 = vadd.f32 %v5652_v61, %v453_v41  ;;  %v633_v50 = vadd.f32 %v5668_v23, %v485_v49  ;;  %v455_v52 = vmul.f32 %v6439_v60, %v5632_v12 }
 0x139   :  { %4511 = vmatprep.subr.bf16.mxu0 %v4510_v53  ;;  %v4518_v28 = vpack.c.bf16 %v4898_v30, %v4896_v43  ;;  %4911 = vtanh.f32 %v1164_v44  ;;  %4371 = vmatmul.mubr.msk.f32.gmra.mrb[50].mxu1 %vm1353_vm0, %v6335_v56  ;;  %v487_v59 = vmul.f32 %v6439_v60, %v5590_v14  ;;  %v1035_v13 = vmul.f32 %v6451_v27, %v5646_v42 }
 0x13a   :  { %4913 = vtanh.f32 %v1196_v16  ;;  %v1161_v45 = vadd.f32 %v1033_v22, %v601_v7  ;;  %v1193_v19 = vadd.f32 %v1065_v31, %v633_v50  ;;  %v603_v3 = vadd.f32 %v5652_v61, %v455_v52  ;;  %2599 = vmatprep.mubr.f32.mxu1 %v6908_v32  ;;  %4368 = vmatmul.mubr.msk.f32.gmra.mrb[52].mxu0 %vm1353_vm0, %v6372_v11 }
 0x13b   :  { %v4900_v12 = vpop.eup %4899  ;;  %4519 = vmatprep.subr.bf16.mxu1 %v4518_v28  ;;  %v635_v48 = vadd.f32 %v5668_v23, %v487_v59  ;;  %v1067_v14 = vmul.f32 %v6451_v27, %v5692_v37  ;;  %2516 = vmatprep.mubr.f32.mxu0 %v6908_v32 }
 0x13c   :  { %v4902_v42 = vpop.eup %4901  ;;  %4915 = vtanh.f32 %v1161_v45  ;;  %v1163_v60 = vadd.f32 %v1035_v13, %v603_v3 }
 0x13d   :  { %v4512_v8 = vpack.c.bf16 %v4902_v42, %v4900_v12  ;;  %4917 = vtanh.f32 %v1193_v19  ;;  %v1195_v61 = vadd.f32 %v1067_v14, %v635_v48  ;;  %4372 = vmatmul.mubr.msk.f32.gmra.mrb[52].mxu1 %vm1353_vm0, %v6372_v11 }
 0x13e   :  { %4919 = vtanh.f32 %v1163_v60  ;;  %2605 = vmatprep.mubr.f32.mxu1 %v6908_v32  ;;  %4369 = vmatmul.mubr.msk.f32.gmra.mrb[54].mxu0 %vm1353_vm0, %v6409_v29 }
 0x13f   :  { %v4904_v23 = vpop.eup %4903  ;;  %4513 = vmatpush1.bf16.msra.mxu0 %v4512_v8  ;;  %4921 = vtanh.f32 %v1195_v61  ;;  %2676 = vmatprep.mubr.f32.mxu0 %v6908_v32 }
 0x140   :  { %v4906_v37 = vpop.eup %4905 }
 0x141   :  { %v4908_v39 = vpop.eup %4907  ;;  %v4520_v33 = vpack.c.bf16 %v4906_v37, %v4904_v23  ;;  %4373 = vmatmul.mubr.msk.f32.gmra.mrb[54].mxu1 %vm1353_vm0, %v6409_v29 }
 0x142   :  { %v4910_v51 = vpop.eup %4909  ;;  %2765 = vmatprep.mubr.f32.mxu1 %v6908_v32 }
 0x143   :  { %v4912_v26 = vpop.eup %4911  ;;  %4521 = vmatpush1.bf16.msra.mxu1 %v4520_v33  ;;  %v4514_v38 = vpack.c.bf16 %v4910_v51, %v4908_v39 }
 0x144   :  { %v4914_v57 = vpop.eup %4913 }
 0x145   :  { %4515 = vmatprep.subr.bf16.mxu0 %v4514_v38  ;;  %v4522_v27 = vpack.c.bf16 %v4914_v57, %v4912_v26 }
 0x146   :  { %v4916_v54 = vpop.eup %4915 }
 0x147   :  { %v4918_v25 = vpop.eup %4917  ;;  %4523 = vmatprep.subr.bf16.mxu1 %v4522_v27 }
 0x148   :  { %v4920_v46 = vpop.eup %4919  ;;  %v4516_v5 = vpack.c.bf16 %v4918_v25, %v4916_v54 }
 0x149   :  { %v4922_v17 = vpop.eup %4921 }
 0x14a   :  { %4517 = vmatpush1.bf16.msra.mxu0 %v4516_v5  ;;  %v4524_v4 = vpack.c.bf16 %v4922_v17, %v4920_v46 }
 0x14c   :  { %4525 = vmatpush1.bf16.msra.mxu1 %v4524_v4 }
 0x14d   :  { %4374 = vmatmul.mubr.msk.f32.vlgmr.msra.gmra.mrb[56].mxu0 %vm1353_vm0, %v6313_v40 }
 0x14e   :  { %2682 = vmatprep.mubr.f32.mxu0 %v6908_v32 }
 0x14f   :  { %4378 = vmatmul.mubr.msk.f32.vlgmr.msra.gmra.mrb[56].mxu1 %vm1353_vm0, %v6313_v40  ;;  %v6545_v40 = vpop.permute.xlu1 %1335 }
 0x150   :  { %2771 = vmatprep.mubr.f32.mxu1 %v6908_v32 }
 0x151   :  { %4375 = vmatmul.mubr.msk.f32.gmra.mrb[58].mxu0 %vm1353_vm0, %v6335_v56 }
 0x152   :  { %2688 = vmatprep.mubr.f32.mxu0 %v6908_v32 }
 0x153   :  { %4379 = vmatmul.mubr.msk.f32.gmra.mrb[58].mxu1 %vm1353_vm0, %v6335_v56  ;;  %v6553_v36 = vpop.permute.xlu1 %1345 }
 0x154   :  { %2777 = vmatprep.mubr.f32.mxu1 %v6908_v32 }
 0x155   :  { %4376 = vmatmul.mubr.msk.f32.gmra.mrb[60].mxu0 %vm1353_vm0, %v6372_v11 }
 0x156   :  { %2694 = vmatprep.mubr.f32.mxu0 %v6908_v32 }
 0x157   :  { %4380 = vmatmul.mubr.msk.f32.gmra.mrb[60].mxu1 %vm1353_vm0, %v6372_v11  ;;  %v6563_v53 = vpop.permute.xlu1 %1350 }
 0x158   :  { %2783 = vmatprep.mubr.f32.mxu1 %v6908_v32 }
 0x159   :  { %4377 = vmatmul.mubr.msk.f32.gmra.mrb[62].mxu0 %vm1353_vm0, %v6409_v29 }
 0x15a   :  { %2996 = vmatprep.mubr.f32.mxu0 %v6908_v32 }
 0x15b   :  { %4381 = vmatmul.mubr.msk.f32.gmra.mrb[62].mxu1 %vm1353_vm0, %v6409_v29 }
 0x15c   :  { %3067 = vmatprep.mubr.f32.mxu1 %v6908_v32 }
 0x189   :  { %v1432_v56 = vpop.f32.mrb[0].mxu0 }
 0x18a   :  { %v1521_v2 = vpop.f32.mrb[0].mxu1  ;;  %v1434_v15 = vpop.f32.mrb[1].mxu0  ;;  %v1433_v55 = vadd.f32 %v1432_v56, %v6545_v40 }
 0x18b   :  { %v1435_v11 = vadd.f32 %v1434_v15, %v6545_v40  ;;  %v1523_v20 = vpop.f32.mrb[1].mxu1  ;;  %v1522_v18 = vadd.f32 %v1521_v2, %v6545_v40 }
 0x18c   :  { %v1524_v9 = vadd.f32 %v1523_v20, %v6545_v40  ;;  %4923 = vtanh.f32 %v1433_v55 }
 0x18d   :  { %4925 = vtanh.f32 %v1435_v11  ;;  %v1438_v29 = vpop.f32.mrb[2].mxu0 }
 0x18e   :  { %4927 = vtanh.f32 %v1524_v9  ;;  %v1439_v1 = vadd.f32 %v1438_v29, %v6549_v24  ;;  %v1527_v63 = vpop.f32.mrb[2].mxu1  ;;  %v1440_v10 = vpop.f32.mrb[3].mxu0 }
 0x18f   :  { %v1528_v21 = vadd.f32 %v1527_v63, %v6549_v24  ;;  %v1441_v62 = vadd.f32 %v1440_v10, %v6549_v24  ;;  %v1529_v34 = vpop.f32.mrb[3].mxu1  ;;  %4929 = vtanh.f32 %v1522_v18 }
 0x190   :  { %4931 = vtanh.f32 %v1439_v1  ;;  %v1530_v35 = vadd.f32 %v1529_v34, %v6549_v24 }
 0x191   :  { %4933 = vtanh.f32 %v1528_v21 }
 0x192   :  { %4935 = vtanh.f32 %v1441_v62  ;;  %v1444_v47 = vpop.f32.mrb[4].mxu0  ;;  %v1533_v6 = vpop.f32.mrb[4].mxu1 }
 0x193   :  { %4937 = vtanh.f32 %v1530_v35  ;;  %v1445_v41 = vadd.f32 %v1444_v47, %v6553_v36  ;;  %v1534_v58 = vadd.f32 %v1533_v6, %v6553_v36  ;;  %v1446_v49 = vpop.f32.mrb[5].mxu0  ;;  %v1535_v22 = vpop.f32.mrb[5].mxu1 }
 0x194   :  { %v1447_v31 = vadd.f32 %v1446_v49, %v6553_v36  ;;  %v1536_v43 = vadd.f32 %v1535_v22, %v6553_v36 }
 0x195   :  { %4939 = vtanh.f32 %v1445_v41 }
 0x196   :  { %v4924_v44 = vpop.eup %4923  ;;  %4941 = vtanh.f32 %v1534_v58  ;;  %v1450_v16 = vpop.f32.mrb[6].mxu0 }
 0x197   :  { %v1539_v30 = vpop.f32.mrb[6].mxu1  ;;  %v4926_v7 = vpop.eup %4925  ;;  %4943 = vtanh.f32 %v1447_v31  ;;  %v1451_v50 = vadd.f32 %v1450_v16, %v6563_v53 }
 0x198   :  { %v1540_v52 = vadd.f32 %v1539_v30, %v6563_v53  ;;  %v1452_v28 = vpop.f32.mrb[7].mxu0  ;;  %v1541_v59 = vpop.f32.mrb[7].mxu1  ;;  %4945 = vtanh.f32 %v1536_v43 }
 0x199   :  { %v4928_v13 = vpop.eup %4927  ;;  %v1453_v45 = vadd.f32 %v1452_v28, %v6563_v53  ;;  %v1542_v19 = vadd.f32 %v1541_v59, %v6563_v53  ;;  %4947 = vtanh.f32 %v1451_v50 }
 0x19a   :  { %v4930_v3 = vpop.eup %4929  ;;  %4949 = vtanh.f32 %v1540_v52  ;;  %v1610_v48 = vpop.f32.mrb[8].mxu0 }
 0x19b   :  { %v4932_v12 = vpop.eup %4931  ;;  %v1699_v14 = vpop.f32.mrb[8].mxu1  ;;  %4951 = vtanh.f32 %v1453_v45  ;;  %v1611_v60 = vadd.f32 %v1610_v48, %v6545_v40  ;;  %v6588_v45 = vld [vmem:[%s6812_s5] sm:$0x1] }
 0x19c   :  { %v4934_v42 = vpop.eup %4933  ;;  %v1700_v8 = vadd.f32 %v1699_v14, %v6545_v40  ;;  %v1612_v61 = vpop.f32.mrb[9].mxu0  ;;  %v4528_v37 = vpack.c.bf16 %v4932_v12, %v4924_v44  ;;  %4953 = vtanh.f32 %v1542_v19 }
 0x19d   :  { %v1701_v23 = vpop.f32.mrb[9].mxu1  ;;  %v4936_v39 = vpop.eup %4935  ;;  %v1613_v33 = vadd.f32 %v1612_v61, %v6545_v40  ;;  %v4536_v26 = vpack.c.bf16 %v4934_v42, %v4930_v3  ;;  %4955 = vtanh.f32 %v1611_v60 }
 0x19e   :  { %v1702_v51 = vadd.f32 %v1701_v23, %v6545_v40  ;;  %v4938_v38 = vpop.eup %4937  ;;  %v4526_v57 = vpack.c.bf16 %v4936_v39, %v4926_v7  ;;  %4957 = vtanh.f32 %v1700_v8  ;;  %v1616_v27 = vpop.f32.mrb[10].mxu0 }
 0x19f   :  { %v1705_v54 = vpop.f32.mrb[10].mxu1  ;;  %v4534_v25 = vpack.c.bf16 %v4938_v38, %v4928_v13  ;;  %v4940_v46 = vpop.eup %4939  ;;  %4959 = vtanh.f32 %v1613_v33  ;;  %v1617_v5 = vadd.f32 %v1616_v27, %v6549_v24 }
 0x1a0   :  { %v1706_v17 = vadd.f32 %v1705_v54, %v6549_v24  ;;  %v1618_v4 = vpop.f32.mrb[11].mxu0  ;;  %v1707_v56 = vpop.f32.mrb[11].mxu1  ;;  %4527 = vmatprep.subr.bf16.mxu0 %v4526_v57  ;;  %4961 = vtanh.f32 %v1702_v51 }
 0x1a1   :  { %v4942_v2 = vpop.eup %4941  ;;  %v1619_v15 = vadd.f32 %v1618_v4, %v6549_v24  ;;  %v1708_v55 = vadd.f32 %v1707_v56, %v6549_v24  ;;  %4535 = vmatprep.subr.bf16.mxu1 %v4534_v25  ;;  %4529 = vmatpush1.bf16.msra.mxu0 %v4528_v37  ;;  %4963 = vtanh.f32 %v1617_v5 }
 0x1a2   :  { %v4944_v11 = vpop.eup %4943  ;;  %4537 = vmatpush1.bf16.msra.mxu1 %v4536_v26  ;;  %4965 = vtanh.f32 %v1706_v17  ;;  %v1622_v18 = vpop.f32.mrb[12].mxu0 }
 0x1a3   :  { %v4946_v20 = vpop.eup %4945  ;;  %v1711_v9 = vpop.f32.mrb[12].mxu1  ;;  %4967 = vtanh.f32 %v1619_v15  ;;  %v1623_v1 = vadd.f32 %v1622_v18, %v6553_v36 }
 0x1a4   :  { %v4948_v29 = vpop.eup %4947  ;;  %v1712_v63 = vadd.f32 %v1711_v9, %v6553_v36  ;;  %v1624_v10 = vpop.f32.mrb[13].mxu0  ;;  %4969 = vtanh.f32 %v1708_v55 }
 0x1a5   :  { %v1713_v21 = vpop.f32.mrb[13].mxu1  ;;  %v4950_v62 = vpop.eup %4949  ;;  %v1625_v34 = vadd.f32 %v1624_v10, %v6553_v36  ;;  %v4532_v47 = vpack.c.bf16 %v4948_v29, %v4940_v46  ;;  %4971 = vtanh.f32 %v1623_v1 }
 0x1a6   :  { %v1714_v35 = vadd.f32 %v1713_v21, %v6553_v36  ;;  %v4952_v6 = vpop.eup %4951  ;;  %v4540_v41 = vpack.c.bf16 %v4950_v62, %v4942_v2  ;;  %4973 = vtanh.f32 %v1712_v63  ;;  %v1717_v49 = vpop.f32.mrb[14].mxu1 }
 0x1a7   :  { %v4954_v58 = vpop.eup %4953  ;;  %v4530_v22 = vpack.c.bf16 %v4952_v6, %v4944_v11  ;;  %4975 = vtanh.f32 %v1625_v34  ;;  %v1628_v43 = vpop.f32.mrb[14].mxu0  ;;  %v1718_v44 = vadd.f32 %v1717_v49, %v6563_v53 }
 0x1a8   :  { %v4956_v31 = vpop.eup %4955  ;;  %v1719_v16 = vpop.f32.mrb[15].mxu1  ;;  %v4538_v30 = vpack.c.bf16 %v4954_v58, %v4946_v20  ;;  %4977 = vtanh.f32 %v1714_v35  ;;  %v1629_v50 = vadd.f32 %v1628_v43, %v6563_v53 }
 0x1a9   :  { %v4958_v7 = vpop.eup %4957  ;;  %v1630_v52 = vpop.f32.mrb[15].mxu0  ;;  %v1720_v28 = vadd.f32 %v1719_v16, %v6563_v53  ;;  %4531 = vmatprep.subr.bf16.mxu0 %v4530_v22  ;;  %4979 = vtanh.f32 %v1718_v44 }
 0x1aa   :  { %v4960_v59 = vpop.eup %4959  ;;  %v1631_v13 = vadd.f32 %v1630_v52, %v6563_v53  ;;  %4539 = vmatprep.subr.bf16.mxu1 %v4538_v30  ;;  %4533 = vmatpush1.bf16.msra.mxu0 %v4532_v47  ;;  %4981 = vtanh.f32 %v1629_v50 }
 0x1ab   :  { %v4962_v19 = vpop.eup %4961  ;;  %4541 = vmatpush1.bf16.msra.mxu1 %v4540_v41  ;;  %v1788_v12 = vpop.f32.mrb[16].mxu0 }
 0x1ac   :  { %v4964_v3 = vpop.eup %4963  ;;  %4983 = vtanh.f32 %v1631_v13  ;;  %v1789_v14 = vadd.f32 %v1788_v12, %v6545_v40  ;;  %v1877_v42 = vpop.f32.mrb[16].mxu1 }
 0x1ad   :  { %v4966_v48 = vpop.eup %4965  ;;  %4985 = vtanh.f32 %v1720_v28  ;;  %v1790_v60 = vpop.f32.mrb[17].mxu0  ;;  %4382 = vmatmul.mubr.msk.f32.vlgmr.msra.gmra.mrb[64].mxu0 %vm1353_vm0, %v6588_v45  ;;  %v4544_v8 = vpack.c.bf16 %v4964_v3, %v4956_v31  ;;  %v1878_v23 = vadd.f32 %v1877_v42, %v6545_v40 }
 0x1ae   :  { %v4968_v61 = vpop.eup %4967  ;;  %v1791_v37 = vadd.f32 %v1790_v60, %v6545_v40  ;;  %v1879_v39 = vpop.f32.mrb[17].mxu1  ;;  %4383 = vmatmul.mubr.msk.f32.vlgmr.msra.gmra.mrb[64].mxu1 %vm1353_vm0, %v6588_v45  ;;  %v4552_v33 = vpack.c.bf16 %v4966_v48, %v4958_v7  ;;  %3138 = vmatprep.mubr.f32.mxu0 %v6908_v32  ;;  %4987 = vtanh.f32 %v1789_v14 }
 0x1af   :  { %v4970_v51 = vpop.eup %4969  ;;  %v1880_v26 = vadd.f32 %v1879_v39, %v6545_v40  ;;  %v4542_v38 = vpack.c.bf16 %v4968_v61, %v4960_v59  ;;  %3209 = vmatprep.mubr.f32.mxu1 %v6908_v32  ;;  %4989 = vtanh.f32 %v1878_v23  ;;  %v1794_v27 = vpop.f32.mrb[18].mxu0 }
 0x1b0   :  { %v4972_v57 = vpop.eup %4971  ;;  %v4550_v54 = vpack.c.bf16 %v4970_v51, %v4962_v19  ;;  %4991 = vtanh.f32 %v1791_v37  ;;  %v1795_v46 = vadd.f32 %v1794_v27, %v6549_v24  ;;  %v1883_v5 = vpop.f32.mrb[18].mxu1 }
 0x1b1   :  { %v4974_v25 = vpop.eup %4973  ;;  %v1796_v17 = vpop.f32.mrb[19].mxu0  ;;  %4543 = vmatprep.subr.bf16.mxu0 %v4542_v38  ;;  %4993 = vtanh.f32 %v1880_v26  ;;  %v1884_v56 = vadd.f32 %v1883_v5, %v6549_v24 }
 0x1b2   :  { %v4976_v4 = vpop.eup %4975  ;;  %v1797_v2 = vadd.f32 %v1796_v17, %v6549_v24  ;;  %v1885_v15 = vpop.f32.mrb[19].mxu1  ;;  %4551 = vmatprep.subr.bf16.mxu1 %v4550_v54  ;;  %4545 = vmatpush1.bf16.msra.mxu0 %v4544_v8  ;;  %4995 = vtanh.f32 %v1795_v46 }
 0x1b3   :  { %v4978_v55 = vpop.eup %4977  ;;  %v1886_v11 = vadd.f32 %v1885_v15, %v6549_v24  ;;  %4553 = vmatpush1.bf16.msra.mxu1 %v4552_v33  ;;  %4997 = vtanh.f32 %v1884_v56  ;;  %v1800_v18 = vpop.f32.mrb[20].mxu0 }
 0x1b4   :  { %v4980_v20 = vpop.eup %4979  ;;  %4999 = vtanh.f32 %v1797_v2  ;;  %v1801_v29 = vadd.f32 %v1800_v18, %v6553_v36  ;;  %v1802_v1 = vpop.f32.mrb[21].mxu0 }
 0x1b5   :  { %v4982_v9 = vpop.eup %4981  ;;  %v4556_v63 = vpack.c.bf16 %v4980_v20, %v4974_v25  ;;  %5001 = vtanh.f32 %v1886_v11  ;;  %v1889_v21 = vpop.f32.mrb[20].mxu1  ;;  %v1803_v62 = vadd.f32 %v1802_v1, %v6553_v36 }
 0x1b6   :  { %v4984_v10 = vpop.eup %4983  ;;  %v4548_v34 = vpack.c.bf16 %v4982_v9, %v4972_v57  ;;  %5003 = vtanh.f32 %v1801_v29  ;;  %v1890_v47 = vadd.f32 %v1889_v21, %v6553_v36  ;;  %v1891_v6 = vpop.f32.mrb[21].mxu1 }
 0x1b7   :  { %v4986_v35 = vpop.eup %4985  ;;  %v4546_v41 = vpack.c.bf16 %v4984_v10, %v4976_v4  ;;  %5005 = vtanh.f32 %v1803_v62  ;;  %v1892_v58 = vadd.f32 %v1891_v6, %v6553_v36  ;;  %v1806_v49 = vpop.f32.mrb[22].mxu0 }
 0x1b8   :  { %v4554_v22 = vpack.c.bf16 %v4986_v35, %v4978_v55  ;;  %v4988_v31 = vpop.eup %4987  ;;  %5007 = vtanh.f32 %v1890_v47  ;;  %v1807_v43 = vadd.f32 %v1806_v49, %v6563_v53  ;;  %v1808_v44 = vpop.f32.mrb[23].mxu0 }
 0x1b9   :  { %4547 = vmatprep.subr.bf16.mxu0 %v4546_v41  ;;  %v4990_v16 = vpop.eup %4989  ;;  %5009 = vtanh.f32 %v1892_v58  ;;  %v1895_v30 = vpop.f32.mrb[22].mxu1  ;;  %v1809_v7 = vadd.f32 %v1808_v44, %v6563_v53 }
 0x1ba   :  { %4555 = vmatprep.subr.bf16.mxu1 %v4554_v22  ;;  %4549 = vmatpush1.bf16.msra.mxu0 %v4548_v34  ;;  %v4992_v50 = vpop.eup %4991  ;;  %5011 = vtanh.f32 %v1807_v43  ;;  %v1896_v52 = vadd.f32 %v1895_v30, %v6563_v53  ;;  %v1897_v28 = vpop.f32.mrb[23].mxu1 }
 0x1bb   :  { %4557 = vmatpush1.bf16.msra.mxu1 %v4556_v63  ;;  %v4994_v59 = vpop.eup %4993  ;;  %5013 = vtanh.f32 %v1809_v7  ;;  %v1898_v13 = vadd.f32 %v1897_v28, %v6563_v53 }
 0x1bc   :  { %v4996_v19 = vpop.eup %4995  ;;  %5015 = vtanh.f32 %v1896_v52 }
 0x1bd   :  { %4384 = vmatmul.mubr.msk.f32.vlgmr.msra.gmra.mrb[66].mxu0 %vm1353_vm0, %v6588_v45  ;;  %v4998_v3 = vpop.eup %4997  ;;  %5017 = vtanh.f32 %v1898_v13  ;;  %v4560_v12 = vpack.c.bf16 %v4996_v19, %v4988_v31 }
 0x1be   :  { %4385 = vmatmul.mubr.msk.f32.vlgmr.msra.gmra.mrb[66].mxu1 %vm1353_vm0, %v6588_v45  ;;  %3280 = vmatprep.mubr.f32.mxu0 %v6908_v32  ;;  %v5000_v48 = vpop.eup %4999  ;;  %v4568_v14 = vpack.c.bf16 %v4998_v3, %v4990_v16 }
 0x1bf   :  { %3351 = vmatprep.mubr.f32.mxu1 %v6908_v32  ;;  %v5002_v42 = vpop.eup %5001  ;;  %v4558_v60 = vpack.c.bf16 %v5000_v48, %v4992_v50 }
 0x1c0   :  { %v5004_v8 = vpop.eup %5003  ;;  %v1966_v61 = vpop.f32.mrb[24].mxu0  ;;  %v4566_v23 = vpack.c.bf16 %v5002_v42, %v4994_v59 }
 0x1c1   :  { %v5006_v37 = vpop.eup %5005  ;;  %v1967_v39 = vadd.f32 %v1966_v61, %v6545_v40  ;;  %v1968_v33 = vpop.f32.mrb[25].mxu0  ;;  %4559 = vmatprep.subr.bf16.mxu0 %v4558_v60 }
 0x1c2   :  { %v5008_v51 = vpop.eup %5007  ;;  %v1969_v26 = vadd.f32 %v1968_v33, %v6545_v40  ;;  %4567 = vmatprep.subr.bf16.mxu1 %v4566_v23  ;;  %4561 = vmatpush1.bf16.msra.mxu0 %v4560_v12  ;;  %v2055_v57 = vpop.f32.mrb[24].mxu1 }
 0x1c3   :  { %v5010_v38 = vpop.eup %5009  ;;  %4569 = vmatpush1.bf16.msra.mxu1 %v4568_v14  ;;  %5019 = vtanh.f32 %v1967_v39  ;;  %v2056_v54 = vadd.f32 %v2055_v57, %v6545_v40  ;;  %v2057_v25 = vpop.f32.mrb[25].mxu1 }
 0x1c4   :  { %v5012_v27 = vpop.eup %5011  ;;  %v1972_v46 = vpop.f32.mrb[26].mxu0  ;;  %5021 = vtanh.f32 %v1969_v26  ;;  %v2058_v17 = vadd.f32 %v2057_v25, %v6545_v40 }
 0x1c5   :  { %v5014_v5 = vpop.eup %5013  ;;  %v1973_v4 = vadd.f32 %v1972_v46, %v6549_v24  ;;  %v1974_v56 = vpop.f32.mrb[27].mxu0  ;;  %v4564_v2 = vpack.c.bf16 %v5012_v27, %v5004_v8  ;;  %5023 = vtanh.f32 %v2056_v54 }
 0x1c6   :  { %v5016_v15 = vpop.eup %5015  ;;  %v1975_v55 = vadd.f32 %v1974_v56, %v6549_v24  ;;  %v4562_v11 = vpack.c.bf16 %v5014_v5, %v5006_v37  ;;  %5025 = vtanh.f32 %v2058_v17  ;;  %v2061_v18 = vpop.f32.mrb[26].mxu1 }
 0x1c7   :  { %v5018_v20 = vpop.eup %5017  ;;  %v4572_v9 = vpack.c.bf16 %v5016_v15, %v5008_v51  ;;  %5027 = vtanh.f32 %v1973_v4  ;;  %v2062_v29 = vadd.f32 %v2061_v18, %v6549_v24  ;;  %v2063_v1 = vpop.f32.mrb[27].mxu1 }
 0x1c8   :  { %4563 = vmatprep.subr.bf16.mxu0 %v4562_v11  ;;  %v4570_v63 = vpack.c.bf16 %v5018_v20, %v5010_v38  ;;  %5029 = vtanh.f32 %v1975_v55  ;;  %v2064_v10 = vadd.f32 %v2063_v1, %v6549_v24 }
 0x1c9   :  { %v1978_v21 = vpop.f32.mrb[28].mxu0  ;;  %4565 = vmatpush1.bf16.msra.mxu0 %v4564_v2  ;;  %5031 = vtanh.f32 %v2062_v29 }
 0x1ca   :  { %v1979_v62 = vadd.f32 %v1978_v21, %v6553_v36  ;;  %v1980_v34 = vpop.f32.mrb[29].mxu0  ;;  %4571 = vmatprep.subr.bf16.mxu1 %v4570_v63  ;;  %5033 = vtanh.f32 %v2064_v10  ;;  %v2067_v47 = vpop.f32.mrb[28].mxu1 }
 0x1cb   :  { %v1981_v35 = vadd.f32 %v1980_v34, %v6553_v36  ;;  %4573 = vmatpush1.bf16.msra.mxu1 %v4572_v9  ;;  %v2068_v6 = vadd.f32 %v2067_v47, %v6553_v36  ;;  %v2069_v41 = vpop.f32.mrb[29].mxu1 }
 0x1cc   :  { %4386 = vmatmul.mubr.msk.f32.vlgmr.msra.gmra.mrb[68].mxu0 %vm1353_vm0, %v6588_v45  ;;  %5035 = vtanh.f32 %v1979_v62  ;;  %v2070_v22 = vadd.f32 %v2069_v41, %v6553_v36 }
 0x1cd   :  { %v1984_v58 = vpop.f32.mrb[30].mxu0  ;;  %3422 = vmatprep.mubr.f32.mxu0 %v6908_v32  ;;  %v5020_v49 = vpop.eup %5019  ;;  %5037 = vtanh.f32 %v1981_v35 }
 0x1ce   :  { %v1985_v31 = vadd.f32 %v1984_v58, %v6563_v53  ;;  %v1986_v43 = vpop.f32.mrb[31].mxu0  ;;  %4387 = vmatmul.mubr.msk.f32.vlgmr.msra.gmra.mrb[68].mxu1 %vm1353_vm0, %v6588_v45  ;;  %v5022_v44 = vpop.eup %5021  ;;  %5039 = vtanh.f32 %v2068_v6 }
 0x1cf   :  { %v1987_v16 = vadd.f32 %v1986_v43, %v6563_v53  ;;  %3493 = vmatprep.mubr.f32.mxu1 %v6908_v32  ;;  %v5024_v30 = vpop.eup %5023  ;;  %5041 = vtanh.f32 %v2070_v22  ;;  %v2073_v7 = vpop.f32.mrb[30].mxu1 }
 0x1d0   :  { %v5026_v50 = vpop.eup %5025  ;;  %5043 = vtanh.f32 %v1985_v31  ;;  %v2074_v52 = vadd.f32 %v2073_v7, %v6563_v53  ;;  %v2075_v28 = vpop.f32.mrb[31].mxu1 }
 0x1d1   :  { %v5028_v59 = vpop.eup %5027  ;;  %5045 = vtanh.f32 %v1987_v16  ;;  %v2076_v13 = vadd.f32 %v2075_v28, %v6563_v53 }
 0x1d2   :  { %v5030_v19 = vpop.eup %5029  ;;  %5047 = vtanh.f32 %v2074_v52  ;;  %v4576_v3 = vpack.c.bf16 %v5028_v59, %v5020_v49 }
 0x1d3   :  { %v5032_v12 = vpop.eup %5031  ;;  %5049 = vtanh.f32 %v2076_v13  ;;  %v4574_v48 = vpack.c.bf16 %v5030_v19, %v5022_v44 }
 0x1d4   :  { %v5034_v14 = vpop.eup %5033  ;;  %v4584_v42 = vpack.c.bf16 %v5032_v12, %v5024_v30 }
 0x1d5   :  { %v2144_v60 = vpop.f32.mrb[32].mxu0  ;;  %4575 = vmatprep.subr.bf16.mxu0 %v4574_v48  ;;  %v4582_v8 = vpack.c.bf16 %v5034_v14, %v5026_v50 }
 0x1d6   :  { %v5036_v61 = vpop.eup %5035  ;;  %v2145_v23 = vadd.f32 %v2144_v60, %v6545_v40  ;;  %v2146_v37 = vpop.f32.mrb[33].mxu0  ;;  %4577 = vmatpush1.bf16.msra.mxu0 %v4576_v3 }
 0x1d7   :  { %v5038_v39 = vpop.eup %5037  ;;  %v2147_v33 = vadd.f32 %v2146_v37, %v6545_v40  ;;  %4583 = vmatprep.subr.bf16.mxu1 %v4582_v8 }
 0x1d8   :  { %v5040_v51 = vpop.eup %5039  ;;  %v2233_v26 = vpop.f32.mrb[32].mxu1  ;;  %4585 = vmatpush1.bf16.msra.mxu1 %v4584_v42  ;;  %5051 = vtanh.f32 %v2145_v23 }
 0x1d9   :  { %v5042_v38 = vpop.eup %5041  ;;  %v2234_v57 = vadd.f32 %v2233_v26, %v6545_v40  ;;  %v2235_v27 = vpop.f32.mrb[33].mxu1  ;;  %5053 = vtanh.f32 %v2147_v33 }
 0x1da   :  { %v2150_v54 = vpop.f32.mrb[34].mxu0  ;;  %v5044_v25 = vpop.eup %5043  ;;  %v2236_v46 = vadd.f32 %v2235_v27, %v6545_v40 }
 0x1db   :  { %v2151_v5 = vadd.f32 %v2150_v54, %v6549_v24  ;;  %v2152_v17 = vpop.f32.mrb[35].mxu0  ;;  %v5046_v4 = vpop.eup %5045  ;;  %5055 = vtanh.f32 %v2234_v57  ;;  %v4580_v2 = vpack.c.bf16 %v5044_v25, %v5036_v61 }
 0x1dc   :  { %v2153_v56 = vadd.f32 %v2152_v17, %v6549_v24  ;;  %v5048_v15 = vpop.eup %5047  ;;  %5057 = vtanh.f32 %v2236_v46  ;;  %v2239_v55 = vpop.f32.mrb[34].mxu1  ;;  %v4578_v11 = vpack.c.bf16 %v5046_v4, %v5038_v39 }
 0x1dd   :  { %v5050_v20 = vpop.eup %5049  ;;  %5059 = vtanh.f32 %v2151_v5  ;;  %v2240_v18 = vadd.f32 %v2239_v55, %v6549_v24  ;;  %v2241_v9 = vpop.f32.mrb[35].mxu1  ;;  %v4588_v29 = vpack.c.bf16 %v5048_v15, %v5040_v51 }
 0x1de   :  { %5061 = vtanh.f32 %v2153_v56  ;;  %v2242_v1 = vadd.f32 %v2241_v9, %v6549_v24  ;;  %v2156_v63 = vpop.f32.mrb[36].mxu0  ;;  %4579 = vmatprep.subr.bf16.mxu0 %v4578_v11  ;;  %v4586_v10 = vpack.c.bf16 %v5050_v20, %v5042_v38 }
 0x1df   :  { %5063 = vtanh.f32 %v2240_v18  ;;  %v2157_v21 = vadd.f32 %v2156_v63, %v6553_v36  ;;  %v2158_v62 = vpop.f32.mrb[37].mxu0  ;;  %4581 = vmatpush1.bf16.msra.mxu0 %v4580_v2 }
 0x1e0   :  { %5065 = vtanh.f32 %v2242_v1  ;;  %v2159_v35 = vadd.f32 %v2158_v62, %v6553_v36  ;;  %4587 = vmatprep.subr.bf16.mxu1 %v4586_v10 }
 0x1e1   :  { %v2245_v34 = vpop.f32.mrb[36].mxu1  ;;  %5067 = vtanh.f32 %v2157_v21  ;;  %4589 = vmatpush1.bf16.msra.mxu1 %v4588_v29 }
 0x1e2   :  { %v2246_v47 = vadd.f32 %v2245_v34, %v6553_v36  ;;  %v2247_v6 = vpop.f32.mrb[37].mxu1  ;;  %5069 = vtanh.f32 %v2159_v35  ;;  %4388 = vmatmul.mubr.msk.f32.vlgmr.msra.gmra.mrb[70].mxu0 %vm1353_vm0, %v6588_v45  ;;  %v5052_v49 = vpop.eup %5051 }
 0x1e3   :  { %v2248_v41 = vadd.f32 %v2247_v6, %v6553_v36  ;;  %v2162_v58 = vpop.f32.mrb[38].mxu0  ;;  %3564 = vmatprep.mubr.f32.mxu0 %v6908_v32  ;;  %v5054_v43 = vpop.eup %5053 }
 0x1e4   :  { %5071 = vtanh.f32 %v2246_v47  ;;  %v2163_v22 = vadd.f32 %v2162_v58, %v6563_v53  ;;  %v2164_v31 = vpop.f32.mrb[39].mxu0  ;;  %4389 = vmatmul.mubr.msk.f32.vlgmr.msra.gmra.mrb[70].mxu1 %vm1353_vm0, %v6588_v45 }
 0x1e5   :  { %5073 = vtanh.f32 %v2248_v41  ;;  %v2251_v44 = vpop.f32.mrb[38].mxu1  ;;  %v2165_v16 = vadd.f32 %v2164_v31, %v6563_v53  ;;  %v5056_v30 = vpop.eup %5055  ;;  %3635 = vmatprep.mubr.f32.mxu1 %v6908_v32 }
 0x1e6   :  { %5075 = vtanh.f32 %v2163_v22  ;;  %v2252_v7 = vadd.f32 %v2251_v44, %v6563_v53  ;;  %v2253_v50 = vpop.f32.mrb[39].mxu1  ;;  %v5058_v52 = vpop.eup %5057 }
 0x1e7   :  { %5077 = vtanh.f32 %v2165_v16  ;;  %v2254_v28 = vadd.f32 %v2253_v50, %v6563_v53  ;;  %v5060_v59 = vpop.eup %5059 }
 0x1e8   :  { %5079 = vtanh.f32 %v2252_v7  ;;  %v5062_v13 = vpop.eup %5061  ;;  %v4592_v19 = vpack.c.bf16 %v5060_v59, %v5052_v49 }
 0x1e9   :  { %5081 = vtanh.f32 %v2254_v28  ;;  %v5064_v3 = vpop.eup %5063  ;;  %v4590_v12 = vpack.c.bf16 %v5062_v13, %v5054_v43 }
 0x1ea   :  { %v5066_v48 = vpop.eup %5065  ;;  %v4600_v14 = vpack.c.bf16 %v5064_v3, %v5056_v30 }
 0x1eb   :  { %v5068_v42 = vpop.eup %5067  ;;  %4591 = vmatprep.subr.bf16.mxu0 %v4590_v12  ;;  %v4598_v60 = vpack.c.bf16 %v5066_v48, %v5058_v52 }
 0x1ec   :  { %v5070_v8 = vpop.eup %5069  ;;  %v2322_v61 = vpop.f32.mrb[40].mxu0  ;;  %4593 = vmatpush1.bf16.msra.mxu0 %v4592_v19 }
 0x1ed   :  { %v2323_v37 = vadd.f32 %v2322_v61, %v6545_v40  ;;  %v2324_v39 = vpop.f32.mrb[41].mxu0  ;;  %4599 = vmatprep.subr.bf16.mxu1 %v4598_v60 }
 0x1ee   :  { %v5072_v23 = vpop.eup %5071  ;;  %v2325_v26 = vadd.f32 %v2324_v39, %v6545_v40  ;;  %4601 = vmatpush1.bf16.msra.mxu1 %v4600_v14 }
 0x1ef   :  { %v5074_v33 = vpop.eup %5073  ;;  %v2411_v51 = vpop.f32.mrb[40].mxu1  ;;  %5083 = vtanh.f32 %v2323_v37 }
 0x1f0   :  { %v5076_v38 = vpop.eup %5075  ;;  %v2412_v57 = vadd.f32 %v2411_v51, %v6545_v40  ;;  %v2413_v27 = vpop.f32.mrb[41].mxu1  ;;  %5085 = vtanh.f32 %v2325_v26 }
 0x1f1   :  { %v5078_v54 = vpop.eup %5077  ;;  %v2414_v25 = vadd.f32 %v2413_v27, %v6545_v40  ;;  %v2328_v46 = vpop.f32.mrb[42].mxu0  ;;  %v4596_v5 = vpack.c.bf16 %v5076_v38, %v5068_v42 }
 0x1f2   :  { %v5080_v17 = vpop.eup %5079  ;;  %5087 = vtanh.f32 %v2412_v57  ;;  %v2329_v4 = vadd.f32 %v2328_v46, %v6549_v24  ;;  %v2330_v56 = vpop.f32.mrb[43].mxu0  ;;  %v4594_v2 = vpack.c.bf16 %v5078_v54, %v5070_v8 }
 0x1f3   :  { %v5082_v15 = vpop.eup %5081  ;;  %5089 = vtanh.f32 %v2414_v25  ;;  %v2417_v55 = vpop.f32.mrb[42].mxu1  ;;  %v2331_v11 = vadd.f32 %v2330_v56, %v6549_v24  ;;  %v4604_v20 = vpack.c.bf16 %v5080_v17, %v5072_v23 }
 0x1f4   :  { %5091 = vtanh.f32 %v2329_v4  ;;  %v2418_v18 = vadd.f32 %v2417_v55, %v6549_v24  ;;  %v2419_v9 = vpop.f32.mrb[43].mxu1  ;;  %4595 = vmatprep.subr.bf16.mxu0 %v4594_v2  ;;  %v4602_v29 = vpack.c.bf16 %v5082_v15, %v5074_v33  ;;  %v2334_v63 = vpop.f32.mrb[44].mxu0 }
 0x1f5   :  { %5093 = vtanh.f32 %v2331_v11  ;;  %v2420_v1 = vadd.f32 %v2419_v9, %v6549_v24  ;;  %4597 = vmatpush1.bf16.msra.mxu0 %v4596_v5  ;;  %v2335_v10 = vadd.f32 %v2334_v63, %v6553_v36  ;;  %v2336_v21 = vpop.f32.mrb[45].mxu0 }
 0x1f6   :  { %5095 = vtanh.f32 %v2418_v18  ;;  %4603 = vmatprep.subr.bf16.mxu1 %v4602_v29  ;;  %v2337_v34 = vadd.f32 %v2336_v21, %v6553_v36 }
 0x1f7   :  { %5097 = vtanh.f32 %v2420_v1  ;;  %v2423_v62 = vpop.f32.mrb[44].mxu1  ;;  %4605 = vmatpush1.bf16.msra.mxu1 %v4604_v20 }
 0x1f8   :  { %v2424_v35 = vadd.f32 %v2423_v62, %v6553_v36  ;;  %v2425_v47 = vpop.f32.mrb[45].mxu1  ;;  %4390 = vmatmul.mubr.msk.f32.vlgmr.msra.gmra.mrb[72].mxu0 %vm1353_vm0, %v6588_v45  ;;  %5099 = vtanh.f32 %v2335_v10 }
 0x1f9   :  { %v2340_v6 = vpop.f32.mrb[46].mxu0  ;;  %3706 = vmatprep.mubr.f32.mxu0 %v6908_v32  ;;  %v5084_v41 = vpop.eup %5083  ;;  %5101 = vtanh.f32 %v2337_v34  ;;  %v2426_v58 = vadd.f32 %v2425_v47, %v6553_v36 }
 0x1fa   :  { %v2341_v49 = vadd.f32 %v2340_v6, %v6563_v53  ;;  %v2342_v22 = vpop.f32.mrb[47].mxu0  ;;  %4391 = vmatmul.mubr.msk.f32.vlgmr.msra.gmra.mrb[72].mxu1 %vm1353_vm0, %v6588_v45  ;;  %v5086_v31 = vpop.eup %5085  ;;  %5103 = vtanh.f32 %v2424_v35 }
 0x1fb   :  { %v2343_v43 = vadd.f32 %v2342_v22, %v6563_v53  ;;  %3777 = vmatprep.mubr.f32.mxu1 %v6908_v32 }
 0x1fc   :  { %v5088_v44 = vpop.eup %5087  ;;  %5105 = vtanh.f32 %v2341_v49  ;;  %v2429_v16 = vpop.f32.mrb[46].mxu1 }
 0x1fd   :  { %v5090_v30 = vpop.eup %5089  ;;  %v2430_v7 = vadd.f32 %v2429_v16, %v6563_v53  ;;  %5107 = vtanh.f32 %v2343_v43  ;;  %v2431_v50 = vpop.f32.mrb[47].mxu1 }
 0x1fe   :  { %v5092_v52 = vpop.eup %5091  ;;  %5109 = vtanh.f32 %v2426_v58  ;;  %v2432_v28 = vadd.f32 %v2431_v50, %v6563_v53 }
 0x1ff   :  { %v5094_v59 = vpop.eup %5093  ;;  %5111 = vtanh.f32 %v2430_v7  ;;  %v4608_v13 = vpack.c.bf16 %v5092_v52, %v5084_v41 }
 0x200   :  { %v5096_v19 = vpop.eup %5095  ;;  %5113 = vtanh.f32 %v2432_v28  ;;  %v4606_v3 = vpack.c.bf16 %v5094_v59, %v5086_v31 }
 0x201   :  { %v5098_v12 = vpop.eup %5097  ;;  %v4616_v48 = vpack.c.bf16 %v5096_v19, %v5088_v44 }
 0x202   :  { %4607 = vmatprep.subr.bf16.mxu0 %v4606_v3  ;;  %v4614_v14 = vpack.c.bf16 %v5098_v12, %v5090_v30  ;;  %v5100_v42 = vpop.eup %5099 }
 0x203   :  { %4609 = vmatpush1.bf16.msra.mxu0 %v4608_v13  ;;  %v5102_v60 = vpop.eup %5101 }
 0x204   :  { %4615 = vmatprep.subr.bf16.mxu1 %v4614_v14  ;;  %v5104_v8 = vpop.eup %5103 }
 0x205   :  { %v2500_v61 = vpop.f32.mrb[48].mxu0  ;;  %4617 = vmatpush1.bf16.msra.mxu1 %v4616_v48 }
 0x206   :  { %v5106_v23 = vpop.eup %5105  ;;  %v2501_v37 = vadd.f32 %v2500_v61, %v6545_v40  ;;  %v2502_v39 = vpop.f32.mrb[49].mxu0 }
 0x207   :  { %v5108_v33 = vpop.eup %5107  ;;  %v2503_v51 = vadd.f32 %v2502_v39, %v6545_v40  ;;  %v4612_v26 = vpack.c.bf16 %v5106_v23, %v5100_v42 }
 0x208   :  { %v5110_v38 = vpop.eup %5109  ;;  %v2589_v57 = vpop.f32.mrb[48].mxu1  ;;  %v4610_v27 = vpack.c.bf16 %v5108_v33, %v5102_v60  ;;  %5115 = vtanh.f32 %v2501_v37 }
 0x209   :  { %v5112_v54 = vpop.eup %5111  ;;  %v2590_v25 = vadd.f32 %v2589_v57, %v6545_v40  ;;  %v2591_v46 = vpop.f32.mrb[49].mxu1  ;;  %5117 = vtanh.f32 %v2503_v51 }
 0x20a   :  { %v2506_v5 = vpop.f32.mrb[50].mxu0  ;;  %v5114_v17 = vpop.eup %5113  ;;  %v2592_v4 = vadd.f32 %v2591_v46, %v6545_v40  ;;  %4611 = vmatprep.subr.bf16.mxu0 %v4610_v27  ;;  %v4620_v15 = vpack.c.bf16 %v5112_v54, %v5104_v8 }
 0x20b   :  { %v2507_v56 = vadd.f32 %v2506_v5, %v6549_v24  ;;  %v2508_v2 = vpop.f32.mrb[51].mxu0  ;;  %5119 = vtanh.f32 %v2590_v25  ;;  %v4618_v11 = vpack.c.bf16 %v5114_v17, %v5110_v38  ;;  %4613 = vmatpush1.bf16.msra.mxu0 %v4612_v26 }
 0x20c   :  { %v2509_v55 = vadd.f32 %v2508_v2, %v6549_v24  ;;  %5121 = vtanh.f32 %v2592_v4  ;;  %v2595_v20 = vpop.f32.mrb[50].mxu1 }
 0x20d   :  { %5123 = vtanh.f32 %v2507_v56  ;;  %v2596_v18 = vadd.f32 %v2595_v20, %v6549_v24  ;;  %v2597_v9 = vpop.f32.mrb[51].mxu1  ;;  %v2512_v29 = vpop.f32.mrb[52].mxu0  ;;  %4619 = vmatprep.subr.bf16.mxu1 %v4618_v11 }
 0x20e   :  { %5125 = vtanh.f32 %v2509_v55  ;;  %v2598_v1 = vadd.f32 %v2597_v9, %v6549_v24  ;;  %v2513_v63 = vadd.f32 %v2512_v29, %v6553_v36  ;;  %v2514_v10 = vpop.f32.mrb[53].mxu0  ;;  %4621 = vmatpush1.bf16.msra.mxu1 %v4620_v15  ;;  %4392 = vmatmul.mubr.msk.f32.vlgmr.msra.gmra.mrb[74].mxu0 %vm1353_vm0, %v6588_v45 }
 0x20f   :  { %5127 = vtanh.f32 %v2596_v18  ;;  %v2515_v21 = vadd.f32 %v2514_v10, %v6553_v36  ;;  %3848 = vmatprep.mubr.f32.mxu0 %v6908_v32 }
 0x210   :  { %5129 = vtanh.f32 %v2598_v1  ;;  %v2601_v62 = vpop.f32.mrb[52].mxu1 }
 0x211   :  { %5131 = vtanh.f32 %v2513_v63  ;;  %v2602_v34 = vadd.f32 %v2601_v62, %v6553_v36  ;;  %v2603_v35 = vpop.f32.mrb[53].mxu1  ;;  %v2518_v47 = vpop.f32.mrb[54].mxu0  ;;  %4393 = vmatmul.mubr.msk.f32.vlgmr.msra.gmra.mrb[74].mxu1 %vm1353_vm0, %v6588_v45 }
 0x212   :  { %5133 = vtanh.f32 %v2515_v21  ;;  %v2604_v6 = vadd.f32 %v2603_v35, %v6553_v36  ;;  %v2519_v41 = vadd.f32 %v2518_v47, %v6563_v53  ;;  %v2520_v58 = vpop.f32.mrb[55].mxu0  ;;  %3919 = vmatprep.mubr.f32.mxu1 %v6908_v32  ;;  %v5116_v49 = vpop.eup %5115 }
 0x213   :  { %5135 = vtanh.f32 %v2602_v34  ;;  %v2521_v22 = vadd.f32 %v2520_v58, %v6563_v53  ;;  %v5118_v31 = vpop.eup %5117 }
 0x214   :  { %5137 = vtanh.f32 %v2604_v6  ;;  %v2607_v43 = vpop.f32.mrb[54].mxu1 }
 0x215   :  { %v5120_v44 = vpop.eup %5119  ;;  %5139 = vtanh.f32 %v2519_v41  ;;  %v2608_v16 = vadd.f32 %v2607_v43, %v6563_v53  ;;  %v2609_v30 = vpop.f32.mrb[55].mxu1 }
 0x216   :  { %v5122_v7 = vpop.eup %5121  ;;  %5141 = vtanh.f32 %v2521_v22  ;;  %v2610_v50 = vadd.f32 %v2609_v30, %v6563_v53 }
 0x217   :  { %v5124_v52 = vpop.eup %5123  ;;  %5143 = vtanh.f32 %v2608_v16 }
 0x218   :  { %v5126_v28 = vpop.eup %5125  ;;  %5145 = vtanh.f32 %v2610_v50  ;;  %v4624_v59 = vpack.c.bf16 %v5124_v52, %v5116_v49 }
 0x219   :  { %v5128_v13 = vpop.eup %5127  ;;  %v4622_v19 = vpack.c.bf16 %v5126_v28, %v5118_v31 }
 0x21a   :  { %v5130_v3 = vpop.eup %5129  ;;  %v4632_v12 = vpack.c.bf16 %v5128_v13, %v5120_v44 }
 0x21b   :  { %v5132_v48 = vpop.eup %5131  ;;  %4623 = vmatprep.subr.bf16.mxu0 %v4622_v19  ;;  %v4630_v14 = vpack.c.bf16 %v5130_v3, %v5122_v7 }
 0x21c   :  { %v5134_v42 = vpop.eup %5133  ;;  %4625 = vmatpush1.bf16.msra.mxu0 %v4624_v59 }
 0x21d   :  { %v5136_v60 = vpop.eup %5135  ;;  %4631 = vmatprep.subr.bf16.mxu1 %v4630_v14 }
 0x21e   :  { %v5138_v8 = vpop.eup %5137  ;;  %4633 = vmatpush1.bf16.msra.mxu1 %v4632_v12 }
 0x21f   :  { %v5140_v61 = vpop.eup %5139 }
 0x220   :  { %v5142_v23 = vpop.eup %5141  ;;  %v2678_v37 = vpop.f32.mrb[56].mxu0  ;;  %v4628_v39 = vpack.c.bf16 %v5140_v61, %v5132_v48 }
 0x221   :  { %v5144_v33 = vpop.eup %5143  ;;  %v2679_v51 = vadd.f32 %v2678_v37, %v6545_v40  ;;  %v2680_v26 = vpop.f32.mrb[57].mxu0  ;;  %v4626_v38 = vpack.c.bf16 %v5142_v23, %v5134_v42  ;;  %v5184_v23 = vld [vmem:[%s6812_s5] sm:$0x1]  ;;  %v5212_v37 = vmov 1966171168   ;;  %s5213_s5 = smov [#allocation3]  }
 0x222   :  { %v5146_v57 = vpop.eup %5145  ;;  %v2767_v27 = vpop.f32.mrb[56].mxu1  ;;  %v2681_v54 = vadd.f32 %v2680_v26, %v6545_v40  ;;  %v4636_v25 = vpack.c.bf16 %v5144_v33, %v5136_v60  ;;  %s4310_s6 = sshll.u32 %s5213_s5, 4  ;;  %s4311_s6 = int_to_ptr.vmem [resolvable:$true] %s4310_s6 }
 0x223   :  { %5147 = vtanh.f32 %v2679_v51  ;;  %v2768_v46 = vadd.f32 %v2767_v27, %v6545_v40  ;;  %v2769_v5 = vpop.f32.mrb[57].mxu1  ;;  %4627 = vmatprep.subr.bf16.mxu0 %v4626_v38  ;;  %v4634_v17 = vpack.c.bf16 %v5146_v57, %v5138_v8  ;;  %v2923_v33 = vpop.permute.xlu0 %2922  ;;  %s5185_s10 = scalar_lea.vmem %s4311_s6, 512  ;;  %p5190_p1 = scmp.lt.s32.totalorder %s4311_s6, %s4311_s6 }
 0x224   :  { %5149 = vtanh.f32 %v2681_v54  ;;  %v2770_v4 = vadd.f32 %v2769_v5, %v6545_v40  ;;  %v2684_v56 = vpop.f32.mrb[58].mxu0  ;;  %4629 = vmatpush1.bf16.msra.mxu0 %v4628_v39  ;;  %v4105_v39 = vunpack.c.l.s4 %v5212_v37  ;;  %v6734_v26 = vrot.slane %v2923_v33, %v6938_v0  ;;  %p5186_p0 = scmp.ne.s32.totalorder %s4311_s6, %s5185_s10  ;;  %p5191_p2 = scmp.lt.s32.totalorder %s5185_s10, %s5185_s10 }
 0x225   :  { %5151 = vtanh.f32 %v2768_v46  ;;  %v2685_v2 = vadd.f32 %v2684_v56, %v6549_v24  ;;  %v2686_v15 = vpop.f32.mrb[59].mxu0  ;;  %4635 = vmatprep.subr.bf16.mxu1 %v4634_v17 }
 0x226   :  { %5153 = vtanh.f32 %v2770_v4  ;;  %v2773_v55 = vpop.f32.mrb[58].mxu1  ;;  %v2687_v11 = vadd.f32 %v2686_v15, %v6549_v24  ;;  %4637 = vmatpush1.bf16.msra.mxu1 %v4636_v25  ;;  %v4106_v51 = vunpack.c.0.s8 %v4105_v39  ;;  %v6943_v25 = vld [vmem:[#allocation6_spill] sm:$0xff]  ;;  %p5192_p3 = por %p5191_p2, %p5190_p1 }
 0x227   :  { %5155 = vtanh.f32 %v2685_v2  ;;  %v2774_v20 = vadd.f32 %v2773_v55, %v6549_v24  ;;  %v2775_v18 = vpop.f32.mrb[59].mxu1  ;;  %4394 = vmatmul.mubr.msk.f32.vlgmr.msra.gmra.mrb[76].mxu0 %vm1353_vm0, %v6588_v45 }
 0x228   :  { %5157 = vtanh.f32 %v2687_v11  ;;  %v2776_v40 = vadd.f32 %v2775_v18, %v6549_v24  ;;  %v2690_v9 = vpop.f32.mrb[60].mxu0  ;;  %3990 = vmatprep.mubr.f32.mxu0 %v6908_v32  ;;  %v6738_v46 = vsub.s32 %v4106_v51, %v6943_v25  ;;  %p5193_p4 = pnand %p5192_p3, %p5186_p0 }
 0x229   :  { %5159 = vtanh.f32 %v2774_v20  ;;  %v2691_v29 = vadd.f32 %v2690_v9, %v6553_v36  ;;  %v2692_v1 = vpop.f32.mrb[61].mxu0  ;;  %4395 = vmatmul.mubr.msk.f32.vlgmr.msra.gmra.mrb[76].mxu1 %vm1353_vm0, %v6588_v45 }
 0x22a   :  { %5161 = vtanh.f32 %v2776_v40  ;;  %v2779_v63 = vpop.f32.mrb[60].mxu1  ;;  %v2693_v10 = vadd.f32 %v2692_v1, %v6553_v36  ;;  %4061 = vmatprep.mubr.f32.mxu1 %v6908_v32 }
 0x22b   :  { %5163 = vtanh.f32 %v2691_v29  ;;  %v2780_v21 = vadd.f32 %v2779_v63, %v6553_v36  ;;  %v2781_v24 = vpop.f32.mrb[61].mxu1 }
 0x22c   :  { %5165 = vtanh.f32 %v2693_v10  ;;  %v2782_v62 = vadd.f32 %v2781_v24, %v6553_v36  ;;  %v2696_v34 = vpop.f32.mrb[62].mxu0 }
 0x22d   :  { %v5148_v35 = vpop.eup %5147  ;;  %5167 = vtanh.f32 %v2780_v21  ;;  %v2697_v47 = vadd.f32 %v2696_v34, %v6563_v53  ;;  %v2698_v6 = vpop.f32.mrb[63].mxu0 }
 0x22e   :  { %v5150_v45 = vpop.eup %5149  ;;  %5169 = vtanh.f32 %v2782_v62  ;;  %v2785_v41 = vpop.f32.mrb[62].mxu1  ;;  %v2699_v58 = vadd.f32 %v2698_v6, %v6563_v53 }
 0x22f   :  { %v5152_v49 = vpop.eup %5151  ;;  %5171 = vtanh.f32 %v2697_v47  ;;  %v2786_v32 = vadd.f32 %v2785_v41, %v6563_v53  ;;  %v2787_v22 = vpop.f32.mrb[63].mxu1 }
 0x230   :  { %v5154_v31 = vpop.eup %5153  ;;  %5173 = vtanh.f32 %v2699_v58  ;;  %v2788_v36 = vadd.f32 %v2787_v22, %v6563_v53 }
 0x231   :  { %v5156_v43 = vpop.eup %5155  ;;  %5175 = vtanh.f32 %v2786_v32 }
 0x232   :  { %v5158_v44 = vpop.eup %5157  ;;  %5177 = vtanh.f32 %v2788_v36  ;;  %v4640_v16 = vpack.c.bf16 %v5156_v43, %v5148_v35 }
 0x233   :  { %v5160_v30 = vpop.eup %5159  ;;  %v4638_v7 = vpack.c.bf16 %v5158_v44, %v5150_v45 }
 0x234   :  { %v5162_v50 = vpop.eup %5161  ;;  %v4648_v52 = vpack.c.bf16 %v5160_v30, %v5152_v49 }
 0x235   :  { %v5164_v28 = vpop.eup %5163  ;;  %4639 = vmatprep.subr.bf16.mxu0 %v4638_v7  ;;  %v4646_v59 = vpack.c.bf16 %v5162_v50, %v5154_v31 }
 0x236   :  { %v5166_v13 = vpop.eup %5165  ;;  %4641 = vmatpush1.bf16.msra.mxu0 %v4640_v16 }
 0x237   :  { %v5168_v19 = vpop.eup %5167  ;;  %4647 = vmatprep.subr.bf16.mxu1 %v4646_v59 }
 0x238   :  { %v5170_v3 = vpop.eup %5169  ;;  %4649 = vmatpush1.bf16.msra.mxu1 %v4648_v52 }
 0x239   :  { %v5172_v12 = vpop.eup %5171 }
 0x23a   :  { %v5174_v53 = vpop.eup %5173  ;;  %v4644_v48 = vpack.c.bf16 %v5172_v12, %v5164_v28 }
 0x23b   :  { %v5176_v14 = vpop.eup %5175  ;;  %v4642_v42 = vpack.c.bf16 %v5174_v53, %v5166_v13 }
 0x23c   :  { %v5178_v60 = vpop.eup %5177  ;;  %v4652_v8 = vpack.c.bf16 %v5176_v14, %v5168_v19 }
 0x23d   :  { %4643 = vmatprep.subr.bf16.mxu0 %v4642_v42  ;;  %v4650_v61 = vpack.c.bf16 %v5178_v60, %v5170_v3 }
 0x23e   :  { %4645 = vmatpush1.bf16.msra.mxu0 %v4644_v48 }
 0x23f   :  { %4651 = vmatprep.subr.bf16.mxu1 %v4650_v61 }
 0x240   :  { %4653 = vmatpush1.bf16.msra.mxu1 %v4652_v8 }
 0x241   :  { %4396 = vmatmul.mubr.msk.f32.vlgmr.msra.gmra.mrb[78].mxu0 %vm1353_vm0, %v5184_v23 }
 0x243   :  { %4397 = vmatmul.mubr.msk.f32.vlgmr.msra.gmra.mrb[78].mxu1 %vm1353_vm0, %v5184_v23 }
 0x280   :  { %v2998_v38 = vpop.f32.mrb[64].mxu0 }
 0x281   :  { %v2999_v57 = vadd.f32 %v2998_v38, %v6734_v26  ;;  %v3069_v27 = vpop.f32.mrb[64].mxu1  ;;  %v3000_v54 = vpop.f32.mrb[65].mxu0 }
 0x282   :  { %v3070_v5 = vadd.f32 %v3069_v27, %v6734_v26  ;;  %v3001_v17 = vadd.f32 %v3000_v54, %v6734_v26  ;;  %v3071_v4 = vpop.f32.mrb[65].mxu1 }
 0x283   :  { %v3072_v56 = vadd.f32 %v3071_v4, %v6734_v26 }
 0x284   :  { %v4100_v2 = vcombine.low %v2999_v57, %v3001_v17 }
 0x285   :  { %v4101_v15 = vcombine.low %v3070_v5, %v3072_v56 }
 0x286   :  { %v4110_v0 = vrot.slane %v4100_v2, %v6738_v46 }
 0x287   :  { %v4117_v55 = vrot.slane %v4101_v15, %v6738_v46 }
 0x289   :  { %v4132_v11 = vcombine.low %v4110_v0, %v4117_v55 }
 0x28b   :  { %v4140_v6 = vrot.slane %v4132_v11, %v6738_v46 }
 0x290   :  { %v3140_v20 = vpop.f32.mrb[66].mxu0 }
 0x291   :  { %v3141_v18 = vadd.f32 %v3140_v20, %v6734_v26  ;;  %v3211_v40 = vpop.f32.mrb[66].mxu1  ;;  %v3142_v9 = vpop.f32.mrb[67].mxu0 }
 0x292   :  { %v3212_v29 = vadd.f32 %v3211_v40, %v6734_v26  ;;  %v3143_v1 = vadd.f32 %v3142_v9, %v6734_v26  ;;  %v3213_v63 = vpop.f32.mrb[67].mxu1 }
 0x293   :  { %v3214_v10 = vadd.f32 %v3213_v63, %v6734_v26 }
 0x294   :  { %v4102_v21 = vcombine.low %v3141_v18, %v3143_v1 }
 0x295   :  { %v4103_v24 = vcombine.low %v3212_v29, %v3214_v10 }
 0x296   :  { %v4124_v62 = vrot.slane %v4102_v21, %v6738_v46 }
 0x297   :  { %v4131_v34 = vrot.slane %v4103_v24, %v6738_v46 }
 0x299   :  { %v4133_v35 = vcombine.low %v4124_v62, %v4131_v34 }
 0x29b   :  { %v4147_v47 = vrot.slane %v4133_v35, %v6738_v46 }
 0x29d   :  { %v4148_v49 = vcombine.low %v4140_v6, %v4147_v47 }
 0x29f   :  { %v3282_v45 = vpop.f32.mrb[68].mxu0  ;;  %4300 = vst [vmem:[#allocation3] sm:$0xff] %v4148_v49 }
 0x2a0   :  { %v3283_v41 = vadd.f32 %v3282_v45, %v6734_v26  ;;  %v3284_v58 = vpop.f32.mrb[69].mxu0 }
 0x2a1   :  { %v3353_v32 = vpop.f32.mrb[68].mxu1  ;;  %v3285_v22 = vadd.f32 %v3284_v58, %v6734_v26 }
 0x2a2   :  { %v3354_v31 = vadd.f32 %v3353_v32, %v6734_v26  ;;  %v3355_v36 = vpop.f32.mrb[69].mxu1 }
 0x2a3   :  { %v4149_v43 = vcombine.low %v3283_v41, %v3285_v22  ;;  %v3356_v44 = vadd.f32 %v3355_v36, %v6734_v26 }
 0x2a5   :  { %v4159_v16 = vrot.slane %v4149_v43, %v6738_v46  ;;  %v4150_v30 = vcombine.low %v3354_v31, %v3356_v44 }
 0x2a7   :  { %v4166_v7 = vrot.slane %v4150_v30, %v6738_v46 }
 0x2a9   :  { %v4181_v50 = vcombine.low %v4159_v16, %v4166_v7 }
 0x2ab   :  { %v4189_v61 = vrot.slane %v4181_v50, %v6738_v46 }
 0x2b5   :  { %v3424_v52 = vpop.f32.mrb[70].mxu0 }
 0x2b6   :  { %v3425_v28 = vadd.f32 %v3424_v52, %v6734_v26  ;;  %v3426_v59 = vpop.f32.mrb[71].mxu0 }
 0x2b7   :  { %v3495_v13 = vpop.f32.mrb[70].mxu1  ;;  %v3427_v19 = vadd.f32 %v3426_v59, %v6734_v26 }
 0x2b8   :  { %v3496_v3 = vadd.f32 %v3495_v13, %v6734_v26  ;;  %v3497_v12 = vpop.f32.mrb[71].mxu1 }
 0x2b9   :  { %v4151_v53 = vcombine.low %v3425_v28, %v3427_v19  ;;  %v3498_v48 = vadd.f32 %v3497_v12, %v6734_v26 }
 0x2bb   :  { %v4173_v14 = vrot.slane %v4151_v53, %v6738_v46  ;;  %v4152_v42 = vcombine.low %v3496_v3, %v3498_v48 }
 0x2bd   :  { %v4180_v60 = vrot.slane %v4152_v42, %v6738_v46 }
 0x2bf   :  { %v4182_v8 = vcombine.low %v4173_v14, %v4180_v60 }
 0x2c1   :  { %v4196_v23 = vrot.slane %v4182_v8, %v6738_v46 }
 0x2c3   :  { %v4197_v37 = vcombine.low %v4189_v61, %v4196_v23 }
 0x2c5   :  { %4301 = vst [vmem:[#allocation3 + $0x8] sm:$0xff] %v4197_v37 }
 0x2cb   :  { %v3566_v39 = vpop.f32.mrb[72].mxu0 }
 0x2cc   :  { %v3567_v33 = vadd.f32 %v3566_v39, %v6734_v26  ;;  %v3568_v51 = vpop.f32.mrb[73].mxu0 }
 0x2cd   :  { %v3637_v38 = vpop.f32.mrb[72].mxu1  ;;  %v3569_v57 = vadd.f32 %v3568_v51, %v6734_v26 }
 0x2ce   :  { %v3638_v27 = vadd.f32 %v3637_v38, %v6734_v26  ;;  %v3639_v54 = vpop.f32.mrb[73].mxu1 }
 0x2cf   :  { %v4198_v25 = vcombine.low %v3567_v33, %v3569_v57  ;;  %v3640_v5 = vadd.f32 %v3639_v54, %v6734_v26 }
 0x2d1   :  { %v4208_v17 = vrot.slane %v4198_v25, %v6738_v46  ;;  %v4199_v4 = vcombine.low %v3638_v27, %v3640_v5 }
 0x2d3   :  { %v4215_v56 = vrot.slane %v4199_v4, %v6738_v46 }
 0x2d5   :  { %v4230_v2 = vcombine.low %v4208_v17, %v4215_v56 }
 0x2d7   :  { %v4238_v24 = vrot.slane %v4230_v2, %v6738_v46 }
 0x2e1   :  { %v3708_v15 = vpop.f32.mrb[74].mxu0 }
 0x2e2   :  { %v3709_v0 = vadd.f32 %v3708_v15, %v6734_v26  ;;  %v3710_v55 = vpop.f32.mrb[75].mxu0 }
 0x2e3   :  { %v3711_v11 = vadd.f32 %v3710_v55, %v6734_v26 }
 0x2e4   :  { %v3779_v20 = vpop.f32.mrb[74].mxu1 }
 0x2e5   :  { %v3780_v18 = vadd.f32 %v3779_v20, %v6734_v26  ;;  %v4200_v40 = vcombine.low %v3709_v0, %v3711_v11  ;;  %v3781_v9 = vpop.f32.mrb[75].mxu1 }
 0x2e6   :  { %v3782_v29 = vadd.f32 %v3781_v9, %v6734_v26 }
 0x2e7   :  { %v4222_v1 = vrot.slane %v4200_v40, %v6738_v46 }
 0x2e8   :  { %v4201_v63 = vcombine.low %v3780_v18, %v3782_v29 }
 0x2ea   :  { %v4229_v10 = vrot.slane %v4201_v63, %v6738_v46 }
 0x2ec   :  { %v4231_v21 = vcombine.low %v4222_v1, %v4229_v10 }
 0x2ee   :  { %v4245_v62 = vrot.slane %v4231_v21, %v6738_v46 }
 0x2f0   :  { %v4246_v34 = vcombine.low %v4238_v24, %v4245_v62 }
 0x2f2   :  { %4302 = vst [vmem:[#allocation3 + $0x10] sm:$0xff] %v4246_v34 }
 0x2fa   :  { %v3850_v35 = vpop.f32.mrb[76].mxu0 }
 0x2fb   :  { %v3851_v47 = vadd.f32 %v3850_v35, %v6734_v26  ;;  %v3852_v6 = vpop.f32.mrb[77].mxu0 }
 0x2fc   :  { %v3921_v45 = vpop.f32.mrb[76].mxu1  ;;  %v3853_v41 = vadd.f32 %v3852_v6, %v6734_v26 }
 0x2fd   :  { %v3922_v58 = vadd.f32 %v3921_v45, %v6734_v26  ;;  %v3923_v49 = vpop.f32.mrb[77].mxu1 }
 0x2fe   :  { %v4247_v32 = vcombine.low %v3851_v47, %v3853_v41  ;;  %v3924_v22 = vadd.f32 %v3923_v49, %v6734_v26 }
 0x300   :  { %v4257_v31 = vrot.slane %v4247_v32, %v6738_v46  ;;  %v4248_v36 = vcombine.low %v3922_v58, %v3924_v22 }
 0x302   :  { %v4264_v43 = vrot.slane %v4248_v36, %v6738_v46 }
 0x304   :  { %v4279_v44 = vcombine.low %v4257_v31, %v4264_v43 }
 0x306   :  { %v4287_v14 = vrot.slane %v4279_v44, %v6738_v46 }
 0x314   :  { %v3992_v16 = vpop.f32.mrb[78].mxu0 }
 0x315   :  { %v3993_v30 = vadd.f32 %v3992_v16, %v6734_v26  ;;  %v3994_v7 = vpop.f32.mrb[79].mxu0 }
 0x316   :  { %v4063_v50 = vpop.f32.mrb[78].mxu1  ;;  %v3995_v52 = vadd.f32 %v3994_v7, %v6734_v26 }
 0x317   :  { %v4064_v28 = vadd.f32 %v4063_v50, %v6734_v26  ;;  %v4065_v59 = vpop.f32.mrb[79].mxu1 }
 0x318   :  { %v4249_v13 = vcombine.low %v3993_v30, %v3995_v52  ;;  %v4066_v19 = vadd.f32 %v4065_v59, %v6734_v26 }
 0x31a   :  { %v4271_v3 = vrot.slane %v4249_v13, %v6738_v46  ;;  %v4250_v12 = vcombine.low %v4064_v28, %v4066_v19 }
 0x31c   :  { %v4278_v53 = vrot.slane %v4250_v12, %v6738_v46 }
 0x31e   :  { %v4280_v48 = vcombine.low %v4271_v3, %v4278_v53 }
 0x320   :  { %v4294_v42 = vrot.slane %v4280_v48, %v6738_v46 }
 0x322   :  { %v4295_v60 = vcombine.low %v4287_v14, %v4294_v42 }
 0x324   :  { %4303 = vst [vmem:[#allocation3 + $0x18] sm:$0xff] %v4295_v60 }
 0x325   :  { %5196 = shalt.err (!%p5193_p4)
}
 0x326   :  { %s5197_s13 = scalar_lea.hbm %s6814_s7, 512 }
 0x327   :  { %p5198_p5 = scmp.ne.s32.totalorder %s6814_s7, %s5197_s13  ;;  %p5201_p6 = scmp.lt.u32.totalorder %s5197_s13, %s6814_s7 }
 0x329   :  { %p5203_p7 = pnand %p5201_p6, %p5198_p5 }
 0x32b   :  { %5206 = shalt.err (!%p5203_p7)
}
 0x32c   :  { %4313 = dma.vmem_to_hbm [thread:$0]  %s4311_s6, 512, %s6814_s7, [#allocation4]  }
 0x32d   :  { %5207 = dma.done.wait [#allocation4], 512  }
 0x32e   :  { %5208 = vsyncadd [#allocation4], 4294966784 }
 0x32f   :  { %4317 = vsyncpa [#allocation4], 1 }

</bundles_post_ra>
